<compile_context>
chip_gen: v7x
topology: tpu7x:2x2x1
jax: 0.10.0
libtpu: 0.0.40
codegen_flags: <defaults>
</compile_context>

<pallas_src>
import functools

import jax
import jax.numpy as jnp
from jax import lax
from jax.experimental import pallas as pl
from jax.experimental.pallas import tpu as pltpu


_UNROLL_LIMIT = 256   # fully unroll the recurrence when a1 * T <= this
_SCAN_UNROLL = 16     # lax.fori_loop unroll for long sequences


def _lstm_step(g_in_t, h, c, whh, H):
    """One LSTM cell step given the precomputed input+bias gate term.

    g-gate columns of whh / g_in_t are pre-scaled by 2 in the wrapper, so
    tanh(z_g) == 2*sigmoid(2*z_g) - 1 comes out of the single fused sigmoid;
    the *2-1 rides an otherwise idle VPU slot.
    """
    gates = g_in_t + jnp.dot(h, whh, preferred_element_type=jnp.float32)   # (B, 4H)
    # One EUP push covers i|f|g|o; gate slices stay in the fused 4H lane
    # layout (regrouping to (B,4,H) would force a lane->sublane relayout).
    sig = jax.nn.sigmoid(gates)
    g_g = 2.0 * sig[:, 2 * H:3 * H] - 1.0          # == tanh of original pre-act
    c_new = sig[:, H:2 * H] * c + sig[:, 0:H] * g_g
    h_new = sig[:, 3 * H:4 * H] * jnp.tanh(c_new)
    return h_new, c_new


def _head(res1_pre, b1, w2, b2, wh, bh, out_ref, sel):
    """ReLU(linear1) -> linear2 -> selected head (linear3 / logsoftmax(linear4))."""
    res1 = jnp.maximum(res1_pre + b1, 0.0)
    res2 = jnp.dot(res1, w2, preferred_element_type=jnp.float32) + b2
    res3 = jnp.dot(res2, wh, preferred_element_type=jnp.float32) + bh
    if sel:
        out_ref[...] = res3
    else:
        m = jnp.max(res3, axis=1, keepdims=True)
        lse = m + jnp.log(jnp.sum(jnp.exp(res3 - m), axis=1, keepdims=True))
        out_ref[...] = res3 - lse                                          # LogSoftmax(dim=1)


def _rnn_unrolled_kernel(x_ref, wih_ref, whh_ref, b_ref, w1_ref, b1_ref,
                         w2_ref, b2_ref, wh_ref, bh_ref, out_ref,
                         *, a1, T, H, sel):
    # x block is lane-dense: (a1, bb, T).
    B = x_ref.shape[1]
    HS0 = w1_ref.shape[2]
    whh = whh_ref[...]                                   # (H, 4H)
    # Hoist the sublane broadcasts once (JAX does not CSE broadcast_in_dim).
    wih_b = jnp.broadcast_to(wih_ref[...], (B, 4 * H))
    bias_b = jnp.broadcast_to(b_ref[...], (B, 4 * H))

    h = jnp.zeros((B, H), jnp.float32)
    c = jnp.zeros((B, H), jnp.float32)
    res1_pre = jnp.zeros((B, HS0), jnp.float32)
    for i in range(a1):
        x_i = x_ref[i]                                   # (bb, T) lane-dense
        last = i == a1 - 1
        for t in range(T):
            # Input + bias gate term: independent of h -> hides in step slack.
            gin_t = x_i[:, t:t + 1] * wih_b + bias_b
            h, c = _lstm_step(gin_t, h, c, whh, H)
            if last:
                # linear1 folded into the loop (off the h->h chain, MXU idle).
                res1_pre = res1_pre + jnp.dot(
                    h, w1_ref[t], preferred_element_type=jnp.float32)

    _head(res1_pre, b1_ref[...], w2_ref[...], b2_ref[...],
          wh_ref[...], bh_ref[...], out_ref, sel)


def _rnn_scan_kernel(x_ref, wih_ref, whh_ref, b_ref, w1_ref, b1_ref,
                     w2_ref, b2_ref, wh_ref, bh_ref, out_ref, gin_ref,
                     *, a1, T, H, sel):
    # x block is (a1, T, bb, 1).
    # TODO(synk): a lane-dense x for this path needs a dynamic-lane slice (or
    # an in-kernel transpose) inside the fori body; kept on the proven padded
    # layout since this path only triggers for a1*T > _UNROLL_LIMIT.
    B = x_ref.shape[2]
    HS0 = w1_ref.shape[2]
    wih = wih_ref[...]
    whh = whh_ref[...]
    bias = b_ref[...]

    h = jnp.zeros((B, H), jnp.float32)
    c = jnp.zeros((B, H), jnp.float32)
    res1_pre = jnp.zeros((B, HS0), jnp.float32)
    for i in range(a1):
        # Precompute the input + bias gate term for the whole sequence,
        # hoisting it off the serial h->h chain.
        gin_ref[...] = x_ref[i] * wih + bias             # (T, bb, 4H)
        last = i == a1 - 1

        if last:
            def step_acc(t, hca):
                h_t, c_t, acc = hca
                h_n, c_n = _lstm_step(gin_ref[t], h_t, c_t, whh, H)
                # linear1 accumulated inside the loop: hides under per-step
                # latency slack; no h-stash scratch / post-loop MXU epilogue.
                acc = acc + jnp.dot(h_n, w1_ref[t],
                                    preferred_element_type=jnp.float32)
                return (h_n, c_n, acc)

            h, c, res1_pre = lax.fori_loop(0, T, step_acc, (h, c, res1_pre),
                                           unroll=_SCAN_UNROLL)
        else:
            def step(t, hc):
                h_t, c_t = hc
                return _lstm_step(gin_ref[t], h_t, c_t, whh, H)

            h, c = lax.fori_loop(0, T, step, (h, c), unroll=_SCAN_UNROLL)

    _head(res1_pre, b1_ref[...], w2_ref[...], b2_ref[...],
          wh_ref[...], bh_ref[...], out_ref, sel)


def _auto_batch_block(B):
    """Generation-aware block policy: one batch block per TensorCore.

    Single-TC chips (v5e/v6e): bb = B, grid=(1,) -> the serial chain is walked
    once.  Multi-TC chips (v7x; v4-class megacore): split the batch into
    exactly num_cores blocks (rounded up to a multiple of 8) so the "parallel"
    grid axis places one block on each core.
    """
    try:
        kind = jax.devices()[0].device_kind.lower()
    except Exception:
        kind = ""
    n_tc = 2 if ("v7" in kind or "v4" in kind) else 1
    if n_tc == 1 or B < 8 * n_tc:
        return B
    bb = -(-B // n_tc)                 # ceil(B / n_tc)
    bb = ((bb + 7) // 8) * 8           # round up to a multiple of 8
    if bb >= B or B % bb:
        return B
    return bb


def rnn_doublehead_pred(x, params, sel=True, batch_block=None):
    """Pallas implementation of RNNdoubleheadPred.forward(x, sel=sel, hidd=False).

    batch_block: None -> auto (one block per TensorCore); otherwise the batch
    is processed in blocks of this size along a "parallel" grid axis.
    """
    # TODO(synk): the `hidd=True` branch (return flattened h_n) is not exposed.
    B, a1, a2 = x.shape
    T = a2
    H = params["w_hh"].shape[1]
    HS0 = params["w1"].shape[0]
    w_head = params["w3"] if sel else params["w4"]
    b_head = params["b3"] if sel else params["b4"]
    OS = w_head.shape[0]

    if batch_block is None:
        bb = _auto_batch_block(B)
    elif batch_block >= B:
        bb = B
    else:
        if B % batch_block or batch_block % 8:
            raise ValueError("batch_block must divide B and be a multiple of 8")
        bb = batch_block
    nblk = B // bb

    unrolled = (a1 * T) <= _UNROLL_LIMIT

    def f32(a):
        return a.astype(jnp.float32)

    # Fold tanh(g) into the fused sigmoid: pre-scale the g-gate columns by 2
    # (power-of-two scaling -> exact in f32); kernel computes 2*sigmoid(.)-1.
    gscale = jnp.ones((4 * H,), jnp.float32).at[2 * H:3 * H].set(2.0)
    wih_s = f32(params["w_ih"].T) * gscale[None, :]                 # (1, 4H)
    whh_s = f32(params["w_hh"].T) * gscale[None, :]                 # (H, 4H)
    bias_s = (f32(params["b_ih"] + params["b_hh"]) * gscale)[None, :]

    # torch: x.view(B, a2, a1); iteration i feeds x_view[:, :, i:i+1] as the
    # length-T sequence.
    x_r = jnp.reshape(x.astype(jnp.float32), (B, T, a1))
    if unrolled:
        # Lane-dense kernel layout (a1, B, T): dense DMA, no 128x lane pad.
        x_k = jnp.transpose(x_r, (2, 0, 1))                         # (a1, B, T)
        x_spec = pl.BlockSpec((a1, bb, T), lambda n: (0, n, 0))
    else:
        x_k = jnp.transpose(x_r, (2, 1, 0))[..., None]              # (a1, T, B, 1)
        x_spec = pl.BlockSpec((a1, T, bb, 1), lambda n: (0, 0, n, 0))

    w1_k = f32(params["w1"].T).reshape(T, H, HS0)                   # t-major rows

    args = (
        x_k,
        wih_s, whh_s, bias_s,                                       # LSTM (scaled)
        w1_k, f32(params["b1"][None, :]),                           # linear1
        f32(params["w2"].T), f32(params["b2"][None, :]),            # linear2
        f32(w_head.T), f32(b_head[None, :]),                        # selected head
    )

    def _full(a):
        nd = a.ndim
        return pl.BlockSpec(a.shape, lambda n, _nd=nd: (0,) * _nd)

    in_specs = [x_spec] + [_full(a) for a in args[1:]]
    out_spec = pl.BlockSpec((bb, OS), lambda n: (n, 0))

    if unrolled:
        kernel = functools.partial(_rnn_unrolled_kernel, a1=a1, T=T, H=H, sel=sel)
        scratch = []
    else:
        kernel = functools.partial(_rnn_scan_kernel, a1=a1, T=T, H=H, sel=sel)
        scratch = [pltpu.VMEM((T, bb, 4 * H), jnp.float32)]

    return pl.pallas_call(
        kernel,
        out_shape=jax.ShapeDtypeStruct((B, OS), jnp.float32),
        grid=(nblk,),
        in_specs=in_specs,
        out_specs=out_spec,
        scratch_shapes=scratch,
        compiler_params=pltpu.CompilerParams(
            dimension_semantics=("parallel",),
            # Explicit ceiling so the scan-path scratches keep compiling on
            # v5e's 16 MiB default scoped VMEM as sizes scale.
            vmem_limit_bytes=32 * 1024 * 1024),
    )(*args)


def init_params(key, ins, hs, os_):
    """Deterministic parameters with PyTorch-style shapes and uniform init."""
    H, HS2 = hs[0], hs[2]
    ks = jax.random.split(key, 12)

    def u(k, shape, fan_in):
        bound = 1.0 / (fan_in ** 0.5)
        return jax.random.uniform(k, shape, jnp.float32, -bound, bound)

    return {
        "w_ih": u(ks[0], (4 * H, 1), H),        # nn.LSTM(1, H) weight_ih_l0
        "w_hh": u(ks[1], (4 * H, H), H),        # weight_hh_l0
        "b_ih": u(ks[2], (4 * H,), H),
        "b_hh": u(ks[3], (4 * H,), H),
        "w1": u(ks[4], (H, ins * H), ins * H),  # Linear(ins*H, H)
        "b1": u(ks[5], (H,), ins * H),
        "w2": u(ks[6], (HS2, H), H),            # Linear(H, HS2)
        "b2": u(ks[7], (HS2,), H),
        "w3": u(ks[8], (os_, HS2), HS2),        # Linear(HS2, os)
        "b3": u(ks[9], (os_,), HS2),
        "w4": u(ks[10], (5, HS2), HS2),         # Linear(HS2, 5)
        "b4": u(ks[11], (5,), HS2),
    }


def forward_ref(x, params, sel=True):
    """Pure-JAX reference mirroring the PyTorch forward exactly."""
    B, a1, a2 = x.shape
    H = params["w_hh"].shape[1]
    x_r = jnp.reshape(x.astype(jnp.float32), (B, a2, a1))
    wih_t, whh_t = params["w_ih"].T, params["w_hh"].T
    b = params["b_ih"] + params["b_hh"]
    h = jnp.zeros((B, H), jnp.float32)
    c = jnp.zeros((B, H), jnp.float32)
    out = None
    for i in range(a1):
        outs = []
        for t in range(a2):
            x_t = x_r[:, t, i:i + 1]
            gates = x_t @ wih_t + h @ whh_t + b
            i_g = jax.nn.sigmoid(gates[:, :H])
            f_g = jax.nn.sigmoid(gates[:, H:2 * H])
            g_g = jnp.tanh(gates[:, 2 * H:3 * H])
            o_g = jax.nn.sigmoid(gates[:, 3 * H:])
            c = f_g * c + i_g * g_g
            h = o_g * jnp.tanh(c)
            outs.append(h)
        out = jnp.stack(outs, axis=1)            # (B, a2, H)
    flat = out.reshape(B, -1)
    res1 = jax.nn.relu(flat @ params["w1"].T + params["b1"])
    res2 = res1 @ params["w2"].T + params["b2"]
    if sel:
        return res2 @ params["w3"].T + params["b3"]
    res4 = res2 @ params["w4"].T + params["b4"]
    return jax.nn.log_softmax(res4, axis=1)


if __name__ == "__main__":
    key = jax.random.PRNGKey(0)
    ref = jax.jit(forward_ref, static_argnames=("sel",))

    # ---- Test 1: shapes as used by fit(): entries.reshape(B, 1, ins) --------
    ins, hs, os_ = 8, (32, 0, 16), 3
    B, a1 = 2, 1
    k1, k2, key = jax.random.split(key, 3)
    x = jax.random.normal(k1, (B, a1, ins), jnp.float32)
    params = init_params(k2, ins, hs, os_)

    out_sel = jax.block_until_ready(rnn_doublehead_pred(x, params, sel=True))
    out_cls = jax.block_until_ready(rnn_doublehead_pred(x, params, sel=False))
    assert out_sel.shape == (B, os_), out_sel.shape
    assert out_cls.shape == (B, 5), out_cls.shape
    assert jnp.allclose(out_sel, ref(x, params, sel=True), atol=1e-4, rtol=1e-4)
    assert jnp.allclose(out_cls, ref(x, params, sel=False), atol=1e-4, rtol=1e-4)

    # ---- Test 2: module-default sequence length (140), batched, auto
    # batch-block policy (fully unrolled path, lane-dense x). ------------------
    ins2, B2 = 140, 16
    k3, k4, key = jax.random.split(key, 3)
    x2 = jax.random.normal(k3, (B2, 1, ins2), jnp.float32)
    params2 = init_params(k4, ins2, hs, os_)

    out2 = jax.block_until_ready(rnn_doublehead_pred(x2, params2, sel=True))
    ref2 = ref(x2, params2, sel=True)
    assert out2.shape == (B2, os_), out2.shape
    # Looser tolerance: 140 recurrent steps accumulate f32-rounding /
    # matmul-precision differences between XLA and Mosaic.
    assert jnp.allclose(out2, ref2, atol=5e-3, rtol=5e-3)

    # ---- Test 3: long sequence (> _UNROLL_LIMIT) + explicit batch blocks:
    # exercises the fori_loop scan path and the multi-block "parallel" grid. ---
    ins3, B3 = 272, 16
    k5, k6 = jax.random.split(key)
    x3 = jax.random.normal(k5, (B3, 1, ins3), jnp.float32)
    params3 = init_params(k6, ins3, hs, os_)

    out3 = jax.block_until_ready(
        rnn_doublehead_pred(x3, params3, sel=True, batch_block=8))
    ref3 = ref(x3, params3, sel=True)
    assert out3.shape == (B3, os_), out3.shape
    assert jnp.allclose(out3, ref3, atol=1e-2, rtol=1e-2)

    print("KERNEL_OK")
</pallas_src>

<mosaic_0001>
module attributes {stable_mosaic.version = 11 : i64} {
  func.func @_rnn_unrolled_kernel(%arg0: i32, %arg1: memref<1x2x8xf32, #tpu.memory_space<vmem>>, %arg2: memref<1x128xf32, #tpu.memory_space<vmem>>, %arg3: memref<32x128xf32, #tpu.memory_space<vmem>>, %arg4: memref<1x128xf32, #tpu.memory_space<vmem>>, %arg5: memref<8x32x32xf32, #tpu.memory_space<vmem>>, %arg6: memref<1x32xf32, #tpu.memory_space<vmem>>, %arg7: memref<32x16xf32, #tpu.memory_space<vmem>>, %arg8: memref<1x16xf32, #tpu.memory_space<vmem>>, %arg9: memref<16x3xf32, #tpu.memory_space<vmem>>, %arg10: memref<1x3xf32, #tpu.memory_space<vmem>>, %arg11: memref<2x3xf32, #tpu.memory_space<vmem>>) attributes {dimension_semantics = [#tpu.dimension_semantics<parallel>], iteration_bounds = array<i64: 1>, scalar_prefetch = 0 : i64, scratch_operands = 0 : i64, tpu.core_type = #tpu.core_type<tc>, window_params = [{transform_indices = @transform_0, window_bounds = array<i64: 1, 2, 8>}, {pipeline_mode = #tpu.pipeline_mode<synchronous>, transform_indices = @transform_1, window_bounds = array<i64: 1, 128>}, {pipeline_mode = #tpu.pipeline_mode<synchronous>, transform_indices = @transform_2, window_bounds = array<i64: 32, 128>}, {pipeline_mode = #tpu.pipeline_mode<synchronous>, transform_indices = @transform_3, window_bounds = array<i64: 1, 128>}, {pipeline_mode = #tpu.pipeline_mode<synchronous>, transform_indices = @transform_4, window_bounds = array<i64: 8, 32, 32>}, {pipeline_mode = #tpu.pipeline_mode<synchronous>, transform_indices = @transform_5, window_bounds = array<i64: 1, 32>}, {pipeline_mode = #tpu.pipeline_mode<synchronous>, transform_indices = @transform_6, window_bounds = array<i64: 32, 16>}, {pipeline_mode = #tpu.pipeline_mode<synchronous>, transform_indices = @transform_7, window_bounds = array<i64: 1, 16>}, {pipeline_mode = #tpu.pipeline_mode<synchronous>, transform_indices = @transform_8, window_bounds = array<i64: 16, 3>}, {pipeline_mode = #tpu.pipeline_mode<synchronous>, transform_indices = @transform_9, window_bounds = array<i64: 1, 3>}, {transform_indices = @transform_10, window_bounds = array<i64: 2, 3>}]} {
    %c0 = arith.constant 0 : index
    %c0_0 = arith.constant 0 : index
    %0 = vector.load %arg3[%c0, %c0_0] : memref<32x128xf32, #tpu.memory_space<vmem>>, vector<32x128xf32>
    %c0_1 = arith.constant 0 : index
    %c0_2 = arith.constant 0 : index
    %1 = vector.load %arg2[%c0_1, %c0_2] : memref<1x128xf32, #tpu.memory_space<vmem>>, vector<1x128xf32>
    %2 = vector.shape_cast %1 : vector<1x128xf32> to vector<1x128xf32>
    %3 = vector.broadcast %2 : vector<1x128xf32> to vector<2x128xf32>
    %c0_3 = arith.constant 0 : index
    %c0_4 = arith.constant 0 : index
    %4 = vector.load %arg4[%c0_3, %c0_4] : memref<1x128xf32, #tpu.memory_space<vmem>>, vector<1x128xf32>
    %5 = vector.shape_cast %4 : vector<1x128xf32> to vector<1x128xf32>
    %6 = vector.broadcast %5 : vector<1x128xf32> to vector<2x128xf32>
    %cst = arith.constant 0.000000e+00 : f32
    %7 = vector.broadcast %cst : f32 to vector<2x32xf32>
    %cst_5 = arith.constant 0.000000e+00 : f32
    %8 = vector.broadcast %cst_5 : f32 to vector<2x32xf32>
    %cst_6 = arith.constant 0.000000e+00 : f32
    %9 = vector.broadcast %cst_6 : f32 to vector<2x32xf32>
    %c0_7 = arith.constant 0 : index
    %c0_8 = arith.constant 0 : index
    %c0_9 = arith.constant 0 : index
    %10 = vector.load %arg1[%c0_7, %c0_8, %c0_9] : memref<1x2x8xf32, #tpu.memory_space<vmem>>, vector<1x2x8xf32>
    %11 = vector.shape_cast %10 : vector<1x2x8xf32> to vector<2x8xf32>
    %12 = vector.extract_strided_slice %11 {offsets = [0, 0], sizes = [2, 1], strides = [1, 1]} : vector<2x8xf32> to vector<2x1xf32>
    %13 = vector.broadcast %12 : vector<2x1xf32> to vector<2x128xf32>
    %14 = arith.mulf %13, %3 : vector<2x128xf32>
    %15 = arith.addf %14, %6 : vector<2x128xf32>
    %cst_10 = arith.constant dense<0.000000e+00> : vector<2x128xf32>
    %16 = tpu.matmul %7, %0, %cst_10 {dimension_numbers = #tpu.dot_dimension_numbers<[1], [0], [0], [1], [0, 0, 1, 1], [], []>} : vector<2x32xf32>, vector<32x128xf32>, vector<2x128xf32> -> vector<2x128xf32>
    %17 = arith.addf %15, %16 : vector<2x128xf32>
    %18 = arith.negf %17 : vector<2x128xf32>
    %19 = math.exp %18 : vector<2x128xf32>
    %cst_11 = arith.constant 1.000000e+00 : f32
    %20 = vector.broadcast %cst_11 : f32 to vector<2x128xf32>
    %21 = arith.addf %20, %19 : vector<2x128xf32>
    %22 = arith.divf %20, %21 : vector<2x128xf32>
    %23 = vector.extract_strided_slice %22 {offsets = [0, 64], sizes = [2, 32], strides = [1, 1]} : vector<2x128xf32> to vector<2x32xf32>
    %cst_12 = arith.constant 2.000000e+00 : f32
    %24 = vector.broadcast %cst_12 : f32 to vector<2x32xf32>
    %25 = arith.mulf %24, %23 : vector<2x32xf32>
    %cst_13 = arith.constant 1.000000e+00 : f32
    %26 = vector.broadcast %cst_13 : f32 to vector<2x32xf32>
    %27 = arith.subf %25, %26 : vector<2x32xf32>
    %28 = vector.extract_strided_slice %22 {offsets = [0, 32], sizes = [2, 32], strides = [1, 1]} : vector<2x128xf32> to vector<2x32xf32>
    %29 = arith.mulf %28, %8 : vector<2x32xf32>
    %30 = vector.extract_strided_slice %22 {offsets = [0, 0], sizes = [2, 32], strides = [1, 1]} : vector<2x128xf32> to vector<2x32xf32>
    %31 = arith.mulf %30, %27 : vector<2x32xf32>
    %32 = arith.addf %29, %31 : vector<2x32xf32>
    %33 = vector.extract_strided_slice %22 {offsets = [0, 96], sizes = [2, 32], strides = [1, 1]} : vector<2x128xf32> to vector<2x32xf32>
    %34 = math.tanh %32 : vector<2x32xf32>
    %35 = arith.mulf %33, %34 : vector<2x32xf32>
    %c0_14 = arith.constant 0 : index
    %c0_15 = arith.constant 0 : index
    %c0_16 = arith.constant 0 : index
    %36 = vector.load %arg5[%c0_14, %c0_15, %c0_16] : memref<8x32x32xf32, #tpu.memory_space<vmem>>, vector<1x32x32xf32>
    %37 = vector.shape_cast %36 : vector<1x32x32xf32> to vector<32x32xf32>
    %cst_17 = arith.constant dense<0.000000e+00> : vector<2x32xf32>
    %38 = tpu.matmul %35, %37, %cst_17 {dimension_numbers = #tpu.dot_dimension_numbers<[1], [0], [0], [1], [0, 0, 1, 1], [], []>} : vector<2x32xf32>, vector<32x32xf32>, vector<2x32xf32> -> vector<2x32xf32>
    %39 = arith.addf %9, %38 : vector<2x32xf32>
    %40 = vector.extract_strided_slice %11 {offsets = [0, 1], sizes = [2, 1], strides = [1, 1]} : vector<2x8xf32> to vector<2x1xf32>
    %41 = vector.broadcast %40 : vector<2x1xf32> to vector<2x128xf32>
    %42 = arith.mulf %41, %3 : vector<2x128xf32>
    %43 = arith.addf %42, %6 : vector<2x128xf32>
    %cst_18 = arith.constant dense<0.000000e+00> : vector<2x128xf32>
    %44 = tpu.matmul %35, %0, %cst_18 {dimension_numbers = #tpu.dot_dimension_numbers<[1], [0], [0], [1], [0, 0, 1, 1], [], []>} : vector<2x32xf32>, vector<32x128xf32>, vector<2x128xf32> -> vector<2x128xf32>
    %45 = arith.addf %43, %44 : vector<2x128xf32>
    %46 = arith.negf %45 : vector<2x128xf32>
    %47 = math.exp %46 : vector<2x128xf32>
    %cst_19 = arith.constant 1.000000e+00 : f32
    %48 = vector.broadcast %cst_19 : f32 to vector<2x128xf32>
    %49 = arith.addf %48, %47 : vector<2x128xf32>
    %50 = arith.divf %48, %49 : vector<2x128xf32>
    %51 = vector.extract_strided_slice %50 {offsets = [0, 64], sizes = [2, 32], strides = [1, 1]} : vector<2x128xf32> to vector<2x32xf32>
    %cst_20 = arith.constant 2.000000e+00 : f32
    %52 = vector.broadcast %cst_20 : f32 to vector<2x32xf32>
    %53 = arith.mulf %52, %51 : vector<2x32xf32>
    %cst_21 = arith.constant 1.000000e+00 : f32
    %54 = vector.broadcast %cst_21 : f32 to vector<2x32xf32>
    %55 = arith.subf %53, %54 : vector<2x32xf32>
    %56 = vector.extract_strided_slice %50 {offsets = [0, 32], sizes = [2, 32], strides = [1, 1]} : vector<2x128xf32> to vector<2x32xf32>
    %57 = arith.mulf %56, %32 : vector<2x32xf32>
    %58 = vector.extract_strided_slice %50 {offsets = [0, 0], sizes = [2, 32], strides = [1, 1]} : vector<2x128xf32> to vector<2x32xf32>
    %59 = arith.mulf %58, %55 : vector<2x32xf32>
    %60 = arith.addf %57, %59 : vector<2x32xf32>
    %61 = vector.extract_strided_slice %50 {offsets = [0, 96], sizes = [2, 32], strides = [1, 1]} : vector<2x128xf32> to vector<2x32xf32>
    %62 = math.tanh %60 : vector<2x32xf32>
    %63 = arith.mulf %61, %62 : vector<2x32xf32>
    %c1 = arith.constant 1 : index
    %c0_22 = arith.constant 0 : index
    %c0_23 = arith.constant 0 : index
    %64 = vector.load %arg5[%c1, %c0_22, %c0_23] : memref<8x32x32xf32, #tpu.memory_space<vmem>>, vector<1x32x32xf32>
    %65 = vector.shape_cast %64 : vector<1x32x32xf32> to vector<32x32xf32>
    %cst_24 = arith.constant dense<0.000000e+00> : vector<2x32xf32>
    %66 = tpu.matmul %63, %65, %cst_24 {dimension_numbers = #tpu.dot_dimension_numbers<[1], [0], [0], [1], [0, 0, 1, 1], [], []>} : vector<2x32xf32>, vector<32x32xf32>, vector<2x32xf32> -> vector<2x32xf32>
    %67 = arith.addf %39, %66 : vector<2x32xf32>
    %68 = vector.extract_strided_slice %11 {offsets = [0, 2], sizes = [2, 1], strides = [1, 1]} : vector<2x8xf32> to vector<2x1xf32>
    %69 = vector.broadcast %68 : vector<2x1xf32> to vector<2x128xf32>
    %70 = arith.mulf %69, %3 : vector<2x128xf32>
    %71 = arith.addf %70, %6 : vector<2x128xf32>
    %cst_25 = arith.constant dense<0.000000e+00> : vector<2x128xf32>
    %72 = tpu.matmul %63, %0, %cst_25 {dimension_numbers = #tpu.dot_dimension_numbers<[1], [0], [0], [1], [0, 0, 1, 1], [], []>} : vector<2x32xf32>, vector<32x128xf32>, vector<2x128xf32> -> vector<2x128xf32>
    %73 = arith.addf %71, %72 : vector<2x128xf32>
    %74 = arith.negf %73 : vector<2x128xf32>
    %75 = math.exp %74 : vector<2x128xf32>
    %cst_26 = arith.constant 1.000000e+00 : f32
    %76 = vector.broadcast %cst_26 : f32 to vector<2x128xf32>
    %77 = arith.addf %76, %75 : vector<2x128xf32>
    %78 = arith.divf %76, %77 : vector<2x128xf32>
    %79 = vector.extract_strided_slice %78 {offsets = [0, 64], sizes = [2, 32], strides = [1, 1]} : vector<2x128xf32> to vector<2x32xf32>
    %cst_27 = arith.constant 2.000000e+00 : f32
    %80 = vector.broadcast %cst_27 : f32 to vector<2x32xf32>
    %81 = arith.mulf %80, %79 : vector<2x32xf32>
    %cst_28 = arith.constant 1.000000e+00 : f32
    %82 = vector.broadcast %cst_28 : f32 to vector<2x32xf32>
    %83 = arith.subf %81, %82 : vector<2x32xf32>
    %84 = vector.extract_strided_slice %78 {offsets = [0, 32], sizes = [2, 32], strides = [1, 1]} : vector<2x128xf32> to vector<2x32xf32>
    %85 = arith.mulf %84, %60 : vector<2x32xf32>
    %86 = vector.extract_strided_slice %78 {offsets = [0, 0], sizes = [2, 32], strides = [1, 1]} : vector<2x128xf32> to vector<2x32xf32>
    %87 = arith.mulf %86, %83 : vector<2x32xf32>
    %88 = arith.addf %85, %87 : vector<2x32xf32>
    %89 = vector.extract_strided_slice %78 {offsets = [0, 96], sizes = [2, 32], strides = [1, 1]} : vector<2x128xf32> to vector<2x32xf32>
    %90 = math.tanh %88 : vector<2x32xf32>
    %91 = arith.mulf %89, %90 : vector<2x32xf32>
    %c2 = arith.constant 2 : index
    %c0_29 = arith.constant 0 : index
    %c0_30 = arith.constant 0 : index
    %92 = vector.load %arg5[%c2, %c0_29, %c0_30] : memref<8x32x32xf32, #tpu.memory_space<vmem>>, vector<1x32x32xf32>
    %93 = vector.shape_cast %92 : vector<1x32x32xf32> to vector<32x32xf32>
    %cst_31 = arith.constant dense<0.000000e+00> : vector<2x32xf32>
    %94 = tpu.matmul %91, %93, %cst_31 {dimension_numbers = #tpu.dot_dimension_numbers<[1], [0], [0], [1], [0, 0, 1, 1], [], []>} : vector<2x32xf32>, vector<32x32xf32>, vector<2x32xf32> -> vector<2x32xf32>
    %95 = arith.addf %67, %94 : vector<2x32xf32>
    %96 = vector.extract_strided_slice %11 {offsets = [0, 3], sizes = [2, 1], strides = [1, 1]} : vector<2x8xf32> to vector<2x1xf32>
    %97 = vector.broadcast %96 : vector<2x1xf32> to vector<2x128xf32>
    %98 = arith.mulf %97, %3 : vector<2x128xf32>
    %99 = arith.addf %98, %6 : vector<2x128xf32>
    %cst_32 = arith.constant dense<0.000000e+00> : vector<2x128xf32>
    %100 = tpu.matmul %91, %0, %cst_32 {dimension_numbers = #tpu.dot_dimension_numbers<[1], [0], [0], [1], [0, 0, 1, 1], [], []>} : vector<2x32xf32>, vector<32x128xf32>, vector<2x128xf32> -> vector<2x128xf32>
    %101 = arith.addf %99, %100 : vector<2x128xf32>
    %102 = arith.negf %101 : vector<2x128xf32>
    %103 = math.exp %102 : vector<2x128xf32>
    %cst_33 = arith.constant 1.000000e+00 : f32
    %104 = vector.broadcast %cst_33 : f32 to vector<2x128xf32>
    %105 = arith.addf %104, %103 : vector<2x128xf32>
    %106 = arith.divf %104, %105 : vector<2x128xf32>
    %107 = vector.extract_strided_slice %106 {offsets = [0, 64], sizes = [2, 32], strides = [1, 1]} : vector<2x128xf32> to vector<2x32xf32>
    %cst_34 = arith.constant 2.000000e+00 : f32
    %108 = vector.broadcast %cst_34 : f32 to vector<2x32xf32>
    %109 = arith.mulf %108, %107 : vector<2x32xf32>
    %cst_35 = arith.constant 1.000000e+00 : f32
    %110 = vector.broadcast %cst_35 : f32 to vector<2x32xf32>
    %111 = arith.subf %109, %110 : vector<2x32xf32>
    %112 = vector.extract_strided_slice %106 {offsets = [0, 32], sizes = [2, 32], strides = [1, 1]} : vector<2x128xf32> to vector<2x32xf32>
    %113 = arith.mulf %112, %88 : vector<2x32xf32>
    %114 = vector.extract_strided_slice %106 {offsets = [0, 0], sizes = [2, 32], strides = [1, 1]} : vector<2x128xf32> to vector<2x32xf32>
    %115 = arith.mulf %114, %111 : vector<2x32xf32>
    %116 = arith.addf %113, %115 : vector<2x32xf32>
    %117 = vector.extract_strided_slice %106 {offsets = [0, 96], sizes = [2, 32], strides = [1, 1]} : vector<2x128xf32> to vector<2x32xf32>
    %118 = math.tanh %116 : vector<2x32xf32>
    %119 = arith.mulf %117, %118 : vector<2x32xf32>
    %c3 = arith.constant 3 : index
    %c0_36 = arith.constant 0 : index
    %c0_37 = arith.constant 0 : index
    %120 = vector.load %arg5[%c3, %c0_36, %c0_37] : memref<8x32x32xf32, #tpu.memory_space<vmem>>, vector<1x32x32xf32>
    %121 = vector.shape_cast %120 : vector<1x32x32xf32> to vector<32x32xf32>
    %cst_38 = arith.constant dense<0.000000e+00> : vector<2x32xf32>
    %122 = tpu.matmul %119, %121, %cst_38 {dimension_numbers = #tpu.dot_dimension_numbers<[1], [0], [0], [1], [0, 0, 1, 1], [], []>} : vector<2x32xf32>, vector<32x32xf32>, vector<2x32xf32> -> vector<2x32xf32>
    %123 = arith.addf %95, %122 : vector<2x32xf32>
    %124 = vector.extract_strided_slice %11 {offsets = [0, 4], sizes = [2, 1], strides = [1, 1]} : vector<2x8xf32> to vector<2x1xf32>
    %125 = vector.broadcast %124 : vector<2x1xf32> to vector<2x128xf32>
    %126 = arith.mulf %125, %3 : vector<2x128xf32>
    %127 = arith.addf %126, %6 : vector<2x128xf32>
    %cst_39 = arith.constant dense<0.000000e+00> : vector<2x128xf32>
    %128 = tpu.matmul %119, %0, %cst_39 {dimension_numbers = #tpu.dot_dimension_numbers<[1], [0], [0], [1], [0, 0, 1, 1], [], []>} : vector<2x32xf32>, vector<32x128xf32>, vector<2x128xf32> -> vector<2x128xf32>
    %129 = arith.addf %127, %128 : vector<2x128xf32>
    %130 = arith.negf %129 : vector<2x128xf32>
    %131 = math.exp %130 : vector<2x128xf32>
    %cst_40 = arith.constant 1.000000e+00 : f32
    %132 = vector.broadcast %cst_40 : f32 to vector<2x128xf32>
    %133 = arith.addf %132, %131 : vector<2x128xf32>
    %134 = arith.divf %132, %133 : vector<2x128xf32>
    %135 = vector.extract_strided_slice %134 {offsets = [0, 64], sizes = [2, 32], strides = [1, 1]} : vector<2x128xf32> to vector<2x32xf32>
    %cst_41 = arith.constant 2.000000e+00 : f32
    %136 = vector.broadcast %cst_41 : f32 to vector<2x32xf32>
    %137 = arith.mulf %136, %135 : vector<2x32xf32>
    %cst_42 = arith.constant 1.000000e+00 : f32
    %138 = vector.broadcast %cst_42 : f32 to vector<2x32xf32>
    %139 = arith.subf %137, %138 : vector<2x32xf32>
    %140 = vector.extract_strided_slice %134 {offsets = [0, 32], sizes = [2, 32], strides = [1, 1]} : vector<2x128xf32> to vector<2x32xf32>
    %141 = arith.mulf %140, %116 : vector<2x32xf32>
    %142 = vector.extract_strided_slice %134 {offsets = [0, 0], sizes = [2, 32], strides = [1, 1]} : vector<2x128xf32> to vector<2x32xf32>
    %143 = arith.mulf %142, %139 : vector<2x32xf32>
    %144 = arith.addf %141, %143 : vector<2x32xf32>
    %145 = vector.extract_strided_slice %134 {offsets = [0, 96], sizes = [2, 32], strides = [1, 1]} : vector<2x128xf32> to vector<2x32xf32>
    %146 = math.tanh %144 : vector<2x32xf32>
    %147 = arith.mulf %145, %146 : vector<2x32xf32>
    %c4 = arith.constant 4 : index
    %c0_43 = arith.constant 0 : index
    %c0_44 = arith.constant 0 : index
    %148 = vector.load %arg5[%c4, %c0_43, %c0_44] : memref<8x32x32xf32, #tpu.memory_space<vmem>>, vector<1x32x32xf32>
    %149 = vector.shape_cast %148 : vector<1x32x32xf32> to vector<32x32xf32>
    %cst_45 = arith.constant dense<0.000000e+00> : vector<2x32xf32>
    %150 = tpu.matmul %147, %149, %cst_45 {dimension_numbers = #tpu.dot_dimension_numbers<[1], [0], [0], [1], [0, 0, 1, 1], [], []>} : vector<2x32xf32>, vector<32x32xf32>, vector<2x32xf32> -> vector<2x32xf32>
    %151 = arith.addf %123, %150 : vector<2x32xf32>
    %152 = vector.extract_strided_slice %11 {offsets = [0, 5], sizes = [2, 1], strides = [1, 1]} : vector<2x8xf32> to vector<2x1xf32>
    %153 = vector.broadcast %152 : vector<2x1xf32> to vector<2x128xf32>
    %154 = arith.mulf %153, %3 : vector<2x128xf32>
    %155 = arith.addf %154, %6 : vector<2x128xf32>
    %cst_46 = arith.constant dense<0.000000e+00> : vector<2x128xf32>
    %156 = tpu.matmul %147, %0, %cst_46 {dimension_numbers = #tpu.dot_dimension_numbers<[1], [0], [0], [1], [0, 0, 1, 1], [], []>} : vector<2x32xf32>, vector<32x128xf32>, vector<2x128xf32> -> vector<2x128xf32>
    %157 = arith.addf %155, %156 : vector<2x128xf32>
    %158 = arith.negf %157 : vector<2x128xf32>
    %159 = math.exp %158 : vector<2x128xf32>
    %cst_47 = arith.constant 1.000000e+00 : f32
    %160 = vector.broadcast %cst_47 : f32 to vector<2x128xf32>
    %161 = arith.addf %160, %159 : vector<2x128xf32>
    %162 = arith.divf %160, %161 : vector<2x128xf32>
    %163 = vector.extract_strided_slice %162 {offsets = [0, 64], sizes = [2, 32], strides = [1, 1]} : vector<2x128xf32> to vector<2x32xf32>
    %cst_48 = arith.constant 2.000000e+00 : f32
    %164 = vector.broadcast %cst_48 : f32 to vector<2x32xf32>
    %165 = arith.mulf %164, %163 : vector<2x32xf32>
    %cst_49 = arith.constant 1.000000e+00 : f32
    %166 = vector.broadcast %cst_49 : f32 to vector<2x32xf32>
    %167 = arith.subf %165, %166 : vector<2x32xf32>
    %168 = vector.extract_strided_slice %162 {offsets = [0, 32], sizes = [2, 32], strides = [1, 1]} : vector<2x128xf32> to vector<2x32xf32>
    %169 = arith.mulf %168, %144 : vector<2x32xf32>
    %170 = vector.extract_strided_slice %162 {offsets = [0, 0], sizes = [2, 32], strides = [1, 1]} : vector<2x128xf32> to vector<2x32xf32>
    %171 = arith.mulf %170, %167 : vector<2x32xf32>
    %172 = arith.addf %169, %171 : vector<2x32xf32>
    %173 = vector.extract_strided_slice %162 {offsets = [0, 96], sizes = [2, 32], strides = [1, 1]} : vector<2x128xf32> to vector<2x32xf32>
    %174 = math.tanh %172 : vector<2x32xf32>
    %175 = arith.mulf %173, %174 : vector<2x32xf32>
    %c5 = arith.constant 5 : index
    %c0_50 = arith.constant 0 : index
    %c0_51 = arith.constant 0 : index
    %176 = vector.load %arg5[%c5, %c0_50, %c0_51] : memref<8x32x32xf32, #tpu.memory_space<vmem>>, vector<1x32x32xf32>
    %177 = vector.shape_cast %176 : vector<1x32x32xf32> to vector<32x32xf32>
    %cst_52 = arith.constant dense<0.000000e+00> : vector<2x32xf32>
    %178 = tpu.matmul %175, %177, %cst_52 {dimension_numbers = #tpu.dot_dimension_numbers<[1], [0], [0], [1], [0, 0, 1, 1], [], []>} : vector<2x32xf32>, vector<32x32xf32>, vector<2x32xf32> -> vector<2x32xf32>
    %179 = arith.addf %151, %178 : vector<2x32xf32>
    %180 = vector.extract_strided_slice %11 {offsets = [0, 6], sizes = [2, 1], strides = [1, 1]} : vector<2x8xf32> to vector<2x1xf32>
    %181 = vector.broadcast %180 : vector<2x1xf32> to vector<2x128xf32>
    %182 = arith.mulf %181, %3 : vector<2x128xf32>
    %183 = arith.addf %182, %6 : vector<2x128xf32>
    %cst_53 = arith.constant dense<0.000000e+00> : vector<2x128xf32>
    %184 = tpu.matmul %175, %0, %cst_53 {dimension_numbers = #tpu.dot_dimension_numbers<[1], [0], [0], [1], [0, 0, 1, 1], [], []>} : vector<2x32xf32>, vector<32x128xf32>, vector<2x128xf32> -> vector<2x128xf32>
    %185 = arith.addf %183, %184 : vector<2x128xf32>
    %186 = arith.negf %185 : vector<2x128xf32>
    %187 = math.exp %186 : vector<2x128xf32>
    %cst_54 = arith.constant 1.000000e+00 : f32
    %188 = vector.broadcast %cst_54 : f32 to vector<2x128xf32>
    %189 = arith.addf %188, %187 : vector<2x128xf32>
    %190 = arith.divf %188, %189 : vector<2x128xf32>
    %191 = vector.extract_strided_slice %190 {offsets = [0, 64], sizes = [2, 32], strides = [1, 1]} : vector<2x128xf32> to vector<2x32xf32>
    %cst_55 = arith.constant 2.000000e+00 : f32
    %192 = vector.broadcast %cst_55 : f32 to vector<2x32xf32>
    %193 = arith.mulf %192, %191 : vector<2x32xf32>
    %cst_56 = arith.constant 1.000000e+00 : f32
    %194 = vector.broadcast %cst_56 : f32 to vector<2x32xf32>
    %195 = arith.subf %193, %194 : vector<2x32xf32>
    %196 = vector.extract_strided_slice %190 {offsets = [0, 32], sizes = [2, 32], strides = [1, 1]} : vector<2x128xf32> to vector<2x32xf32>
    %197 = arith.mulf %196, %172 : vector<2x32xf32>
    %198 = vector.extract_strided_slice %190 {offsets = [0, 0], sizes = [2, 32], strides = [1, 1]} : vector<2x128xf32> to vector<2x32xf32>
    %199 = arith.mulf %198, %195 : vector<2x32xf32>
    %200 = arith.addf %197, %199 : vector<2x32xf32>
    %201 = vector.extract_strided_slice %190 {offsets = [0, 96], sizes = [2, 32], strides = [1, 1]} : vector<2x128xf32> to vector<2x32xf32>
    %202 = math.tanh %200 : vector<2x32xf32>
    %203 = arith.mulf %201, %202 : vector<2x32xf32>
    %c6 = arith.constant 6 : index
    %c0_57 = arith.constant 0 : index
    %c0_58 = arith.constant 0 : index
    %204 = vector.load %arg5[%c6, %c0_57, %c0_58] : memref<8x32x32xf32, #tpu.memory_space<vmem>>, vector<1x32x32xf32>
    %205 = vector.shape_cast %204 : vector<1x32x32xf32> to vector<32x32xf32>
    %cst_59 = arith.constant dense<0.000000e+00> : vector<2x32xf32>
    %206 = tpu.matmul %203, %205, %cst_59 {dimension_numbers = #tpu.dot_dimension_numbers<[1], [0], [0], [1], [0, 0, 1, 1], [], []>} : vector<2x32xf32>, vector<32x32xf32>, vector<2x32xf32> -> vector<2x32xf32>
    %207 = arith.addf %179, %206 : vector<2x32xf32>
    %208 = vector.extract_strided_slice %11 {offsets = [0, 7], sizes = [2, 1], strides = [1, 1]} : vector<2x8xf32> to vector<2x1xf32>
    %209 = vector.broadcast %208 : vector<2x1xf32> to vector<2x128xf32>
    %210 = arith.mulf %209, %3 : vector<2x128xf32>
    %211 = arith.addf %210, %6 : vector<2x128xf32>
    %cst_60 = arith.constant dense<0.000000e+00> : vector<2x128xf32>
    %212 = tpu.matmul %203, %0, %cst_60 {dimension_numbers = #tpu.dot_dimension_numbers<[1], [0], [0], [1], [0, 0, 1, 1], [], []>} : vector<2x32xf32>, vector<32x128xf32>, vector<2x128xf32> -> vector<2x128xf32>
    %213 = arith.addf %211, %212 : vector<2x128xf32>
    %214 = arith.negf %213 : vector<2x128xf32>
    %215 = math.exp %214 : vector<2x128xf32>
    %cst_61 = arith.constant 1.000000e+00 : f32
    %216 = vector.broadcast %cst_61 : f32 to vector<2x128xf32>
    %217 = arith.addf %216, %215 : vector<2x128xf32>
    %218 = arith.divf %216, %217 : vector<2x128xf32>
    %219 = vector.extract_strided_slice %218 {offsets = [0, 64], sizes = [2, 32], strides = [1, 1]} : vector<2x128xf32> to vector<2x32xf32>
    %cst_62 = arith.constant 2.000000e+00 : f32
    %220 = vector.broadcast %cst_62 : f32 to vector<2x32xf32>
    %221 = arith.mulf %220, %219 : vector<2x32xf32>
    %cst_63 = arith.constant 1.000000e+00 : f32
    %222 = vector.broadcast %cst_63 : f32 to vector<2x32xf32>
    %223 = arith.subf %221, %222 : vector<2x32xf32>
    %224 = vector.extract_strided_slice %218 {offsets = [0, 32], sizes = [2, 32], strides = [1, 1]} : vector<2x128xf32> to vector<2x32xf32>
    %225 = arith.mulf %224, %200 : vector<2x32xf32>
    %226 = vector.extract_strided_slice %218 {offsets = [0, 0], sizes = [2, 32], strides = [1, 1]} : vector<2x128xf32> to vector<2x32xf32>
    %227 = arith.mulf %226, %223 : vector<2x32xf32>
    %228 = arith.addf %225, %227 : vector<2x32xf32>
    %229 = vector.extract_strided_slice %218 {offsets = [0, 96], sizes = [2, 32], strides = [1, 1]} : vector<2x128xf32> to vector<2x32xf32>
    %230 = math.tanh %228 : vector<2x32xf32>
    %231 = arith.mulf %229, %230 : vector<2x32xf32>
    %c7 = arith.constant 7 : index
    %c0_64 = arith.constant 0 : index
    %c0_65 = arith.constant 0 : index
    %232 = vector.load %arg5[%c7, %c0_64, %c0_65] : memref<8x32x32xf32, #tpu.memory_space<vmem>>, vector<1x32x32xf32>
    %233 = vector.shape_cast %232 : vector<1x32x32xf32> to vector<32x32xf32>
    %cst_66 = arith.constant dense<0.000000e+00> : vector<2x32xf32>
    %234 = tpu.matmul %231, %233, %cst_66 {dimension_numbers = #tpu.dot_dimension_numbers<[1], [0], [0], [1], [0, 0, 1, 1], [], []>} : vector<2x32xf32>, vector<32x32xf32>, vector<2x32xf32> -> vector<2x32xf32>
    %235 = arith.addf %207, %234 : vector<2x32xf32>
    %c0_67 = arith.constant 0 : index
    %c0_68 = arith.constant 0 : index
    %236 = vector.load %arg6[%c0_67, %c0_68] : memref<1x32xf32, #tpu.memory_space<vmem>>, vector<1x32xf32>
    %c0_69 = arith.constant 0 : index
    %c0_70 = arith.constant 0 : index
    %237 = vector.load %arg7[%c0_69, %c0_70] : memref<32x16xf32, #tpu.memory_space<vmem>>, vector<32x16xf32>
    %c0_71 = arith.constant 0 : index
    %c0_72 = arith.constant 0 : index
    %238 = vector.load %arg8[%c0_71, %c0_72] : memref<1x16xf32, #tpu.memory_space<vmem>>, vector<1x16xf32>
    %c0_73 = arith.constant 0 : index
    %c0_74 = arith.constant 0 : index
    %239 = vector.load %arg9[%c0_73, %c0_74] : memref<16x3xf32, #tpu.memory_space<vmem>>, vector<16x3xf32>
    %c0_75 = arith.constant 0 : index
    %c0_76 = arith.constant 0 : index
    %240 = vector.load %arg10[%c0_75, %c0_76] : memref<1x3xf32, #tpu.memory_space<vmem>>, vector<1x3xf32>
    %241 = vector.broadcast %236 : vector<1x32xf32> to vector<2x32xf32>
    %242 = arith.addf %235, %241 : vector<2x32xf32>
    %cst_77 = arith.constant 0.000000e+00 : f32
    %243 = vector.broadcast %cst_77 : f32 to vector<2x32xf32>
    %244 = arith.maximumf %242, %243 : vector<2x32xf32>
    %cst_78 = arith.constant dense<0.000000e+00> : vector<2x16xf32>
    %245 = tpu.matmul %244, %237, %cst_78 {dimension_numbers = #tpu.dot_dimension_numbers<[1], [0], [0], [1], [0, 0, 1, 1], [], []>} : vector<2x32xf32>, vector<32x16xf32>, vector<2x16xf32> -> vector<2x16xf32>
    %246 = vector.broadcast %238 : vector<1x16xf32> to vector<2x16xf32>
    %247 = arith.addf %245, %246 : vector<2x16xf32>
    %cst_79 = arith.constant dense<0.000000e+00> : vector<2x3xf32>
    %248 = tpu.matmul %247, %239, %cst_79 {dimension_numbers = #tpu.dot_dimension_numbers<[1], [0], [0], [1], [0, 0, 1, 1], [], []>} : vector<2x16xf32>, vector<16x3xf32>, vector<2x3xf32> -> vector<2x3xf32>
    %249 = vector.broadcast %240 : vector<1x3xf32> to vector<2x3xf32>
    %250 = arith.addf %248, %249 : vector<2x3xf32>
    %c0_80 = arith.constant 0 : index
    %c0_81 = arith.constant 0 : index
    %251 = vector.load %arg11[%c0_80, %c0_81] : memref<2x3xf32, #tpu.memory_space<vmem>>, vector<2x3xf32>
    tpu.vector_store %arg11[%c0_80, %c0_81], %250 {strides = array<i32>} : memref<2x3xf32, #tpu.memory_space<vmem>>, vector<2x3xf32>,
    return
  }
  func.func @transform_0(%arg0: i32) -> (i32, i32, i32) {
    %c0_i32 = arith.constant 0 : i32
    %c0_i32_0 = arith.constant 0 : i32
    %c0_i32_1 = arith.constant 0 : i32
    return %c0_i32, %arg0, %c0_i32_0 : i32, i32, i32
  }
  func.func @transform_1(%arg0: i32) -> (i32, i32) {
    %c0_i32 = arith.constant 0 : i32
    %c0_i32_0 = arith.constant 0 : i32
    %c0_i32_1 = arith.constant 0 : i32
    return %c0_i32, %c0_i32_0 : i32, i32
  }
  func.func @transform_2(%arg0: i32) -> (i32, i32) {
    %c0_i32 = arith.constant 0 : i32
    %c0_i32_0 = arith.constant 0 : i32
    %c0_i32_1 = arith.constant 0 : i32
    return %c0_i32, %c0_i32_0 : i32, i32
  }
  func.func @transform_3(%arg0: i32) -> (i32, i32) {
    %c0_i32 = arith.constant 0 : i32
    %c0_i32_0 = arith.constant 0 : i32
    %c0_i32_1 = arith.constant 0 : i32
    return %c0_i32, %c0_i32_0 : i32, i32
  }
  func.func @transform_4(%arg0: i32) -> (i32, i32, i32) {
    %c0_i32 = arith.constant 0 : i32
    %c0_i32_0 = arith.constant 0 : i32
    %c0_i32_1 = arith.constant 0 : i32
    %c0_i32_2 = arith.constant 0 : i32
    return %c0_i32, %c0_i32_0, %c0_i32_1 : i32, i32, i32
  }
  func.func @transform_5(%arg0: i32) -> (i32, i32) {
    %c0_i32 = arith.constant 0 : i32
    %c0_i32_0 = arith.constant 0 : i32
    %c0_i32_1 = arith.constant 0 : i32
    return %c0_i32, %c0_i32_0 : i32, i32
  }
  func.func @transform_6(%arg0: i32) -> (i32, i32) {
    %c0_i32 = arith.constant 0 : i32
    %c0_i32_0 = arith.constant 0 : i32
    %c0_i32_1 = arith.constant 0 : i32
    return %c0_i32, %c0_i32_0 : i32, i32
  }
  func.func @transform_7(%arg0: i32) -> (i32, i32) {
    %c0_i32 = arith.constant 0 : i32
    %c0_i32_0 = arith.constant 0 : i32
    %c0_i32_1 = arith.constant 0 : i32
    return %c0_i32, %c0_i32_0 : i32, i32
  }
  func.func @transform_8(%arg0: i32) -> (i32, i32) {
    %c0_i32 = arith.constant 0 : i32
    %c0_i32_0 = arith.constant 0 : i32
    %c0_i32_1 = arith.constant 0 : i32
    return %c0_i32, %c0_i32_0 : i32, i32
  }
  func.func @transform_9(%arg0: i32) -> (i32, i32) {
    %c0_i32 = arith.constant 0 : i32
    %c0_i32_0 = arith.constant 0 : i32
    %c0_i32_1 = arith.constant 0 : i32
    return %c0_i32, %c0_i32_0 : i32, i32
  }
  func.func @transform_10(%arg0: i32) -> (i32, i32) {
    %c0_i32 = arith.constant 0 : i32
    %c0_i32_0 = arith.constant 0 : i32
    return %arg0, %c0_i32 : i32, i32
  }
}

</mosaic_0001>

<bundles_post_ra>
// kernel: tpu_custom_call.1
= control target key start
LH: loop header
LB: loop body
LE: loop exit
PB: predicated region body
PF: predicated region fallthrough
CT: control target
= control target key end

     0   :  { %15 = vsyncpa [#allocation3], 0  ;;  %s2588_s0 = inlined_call_operand.vmem [shape: f32[1,2,8], index: 0, kind: input, shape index: {}]   ;;  %s2589_s1 = inlined_call_operand.vmem [shape: f32[1,128], index: 1, kind: input, shape index: {}]   ;;  %s2590_s2 = inlined_call_operand.vmem [shape: f32[32,128], index: 2, kind: input, shape index: {}]   ;;  %s2591_s3 = inlined_call_operand.vmem [shape: f32[1,128], index: 3, kind: input, shape index: {}]   ;;  %s2592_s4 = inlined_call_operand.hbm [shape: f32[8,32,32], index: 4, kind: input, shape index: {}]   ;;  %s2593_s5 = inlined_call_operand.vmem [shape: f32[1,32], index: 5, kind: input, shape index: {}]   ;;  %s2594_s6 = inlined_call_operand.vmem [shape: f32[32,16], index: 6, kind: input, shape index: {}]   ;;  %s2595_s7 = inlined_call_operand.vmem [shape: f32[1,16], index: 7, kind: input, shape index: {}]   ;;  %s2596_s8 = inlined_call_operand.vmem [shape: f32[16,3], index: 8, kind: input, shape index: {}]   ;;  %s2597_s9 = inlined_call_operand.vmem [shape: f32[1,3], index: 9, kind: input, shape index: {}]   ;;  %s2598_s10 = inlined_call_operand.hbm [shape: f32[2,3], index: 10, kind: output, shape index: {}]  }
   0x1   :  { %16 = vsyncpa [#allocation4], 0  ;;  %s2274_s13 = smov [#allocation2]   ;;  %s2226_s17 = scalar_lea.hbm %s2592_s4, 4096 }
   0x2   :  { %s30_s14 = sshll.u32 %s2274_s13, 4  ;;  %p2227_p0 = scmp.ne.s32.totalorder %s2592_s4, %s2226_s17  ;;  %s31_s14 = int_to_ptr.vmem [resolvable:$true] %s30_s14 }
   0x3   :  { %p2230_p1 = scmp.lt.u32.totalorder %s2226_s17, %s2592_s4 }
   0x5   :  { %p2232_p2 = pnand %p2230_p1, %p2227_p0 }
   0x7   :  { %2235 = shalt.err (!%p2232_p2)
}
   0x8   :  { %s2236_s22 = scalar_lea.vmem %s31_s14, 4096  ;;  %p2241_p4 = scmp.lt.s32.totalorder %s31_s14, %s31_s14 }
   0x9   :  { %p2237_p3 = scmp.ne.s32.totalorder %s31_s14, %s2236_s22  ;;  %p2242_p5 = scmp.lt.s32.totalorder %s2236_s22, %s2236_s22 }
   0xb   :  { %p2243_p6 = por %p2242_p5, %p2241_p4 }
   0xd   :  { %p2244_p7 = pnand %p2243_p6, %p2237_p3 }
   0xf   :  { %2247 = shalt.err (!%p2244_p7)
}
  0x10   :  { %s2275_s23 = smov 128   ;;  %s2276_s24 = smov 8  }
  0x11   :  { %36 = dma.hbm_to_vmem [thread:$0]  %s2592_s4, 4096, %s31_s14, [#allocation3], %s2275_s23, %s2275_s23, %s2276_s24  }
  0x12   :  { %2270 = dma.done.wait [#allocation3], 4096  }
  0x13   :  { %2271 = vsyncadd [#allocation3], 4294963200  ;;  %v2277_v0 = vmov 0.0|0.0   ;;  %vm2278_vm0 = vmmov 0   ;;  %v2279_v1 = vmov 0.0   ;;  %v2280_v2 = vmov 0  }
  0x14   :  { %2048 = vmatprep.subr.bf16.mxu0 %v2277_v0  ;;  %1862 = vmatprep.mubr.msk.f32.mxu0 %vm2278_vm0, %v2279_v1  ;;  %v50_v3 = vld [vmem:[%s2590_s2] sm:$0xff]  ;;  %v51_v4 = vld [vmem:[%s2590_s2 + $0x8] sm:$0xff]  ;;  %v52_v5 = vld [vmem:[%s2590_s2 + $0x10] sm:$0xff]  ;;  %v2283_v30 = vmov 1   ;;  %vm76_vm1 = vcmask 261120   ;;  %vm1637_vm2 = vcmask 130048  }
  0x15   :  { %2170 = vset.pattern.permute.xlu0 %v2280_v2  ;;  %2054 = vmatprep.subr.bf16.mxu1 %v2277_v0  ;;  %v2373_v6 = vpack.c.bf16 %v51_v4, %v50_v3  ;;  %v53_v7 = vld [vmem:[%s2590_s2 + $0x18] sm:$0xff]  ;;  %v2381_v8 = vld [vmem:[%s2588_s0] sm:$0x3]  ;;  %v177_v34 = vld [vmem:[#allocation2 + $0x8] sm:$0xff]  ;;  %v2284_v4 = vmov 2   ;;  %vm1711_vm3 = vcmask 17408  }
  0x16   :  { %1873 = vmatprep.mubr.msk.f32.mxu1 %vm2278_vm0, %v2279_v1  ;;  %71 = vperm.xlu0 %2170, %v2381_v8   ;;  %v2385_v9 = vpack.c.bf16 %v53_v7, %v52_v5  ;;  %v2400_v11 = vld [vmem:[%s2589_s1] ss:$0 sm:$0xff]  ;;  %s2281_s1 = smov 64   ;;  %v178_v36 = vld [vmem:[#allocation2 + $0x10] sm:$0xff]  ;;  %v179_v37 = vld [vmem:[#allocation2 + $0x18] sm:$0xff] }
  0x17   :  { %2050 = vmatpush3.bf16.msra.mxu0 %v2373_v6  ;;  %2056 = vmatpush3.bf16.msra.mxu1 %v2373_v6  ;;  %v2406_v13 = vld [vmem:[%s2591_s3] ss:$0 sm:$0xff]  ;;  %s2282_s3 = smov 32   ;;  %v2070_v39 = vpack.c.bf16 %v179_v37, %v178_v36  ;;  %v289_v60 = vld [vmem:[#allocation2 + $0x28] sm:$0xff]  ;;  %v290_v61 = vld [vmem:[#allocation2 + $0x30] sm:$0xff] }
  0x18   :  { %2051 = vmatprep.subr.bf16.mxu0 %v2277_v0  ;;  %2057 = vmatprep.subr.bf16.mxu1 %v2277_v0  ;;  %v176_v33 = vld [vmem:[#allocation2] sm:$0xff]  ;;  %v291_v63 = vld [vmem:[#allocation2 + $0x38] sm:$0xff] }
  0x19   :  { %2171 = vset.pattern.permute.xlu1 %v2283_v30  ;;  %v2067_v35 = vpack.c.bf16 %v177_v34, %v176_v33  ;;  %v288_v59 = vld [vmem:[#allocation2 + $0x20] sm:$0xff]  ;;  %v2064_v2 = vpack.c.bf16 %v291_v63, %v290_v61  ;;  %v541_v34 = vld [vmem:[#allocation2 + $0x48] sm:$0xff]  ;;  %v543_v37 = vld [vmem:[#allocation2 + $0x58] sm:$0xff] }
  0x1a   :  { %v2061_v62 = vpack.c.bf16 %v289_v60, %v288_v59  ;;  %2172 = vset.pattern.permute.xlu0 %v2284_v4  ;;  %v540_v33 = vld [vmem:[#allocation2 + $0x40] sm:$0xff]  ;;  %v725_v4 = vld [vmem:[#allocation2 + $0x70] sm:$0xff] }
  0x1b   :  { %2053 = vmatpush3.bf16.msra.mxu0 %v2385_v9  ;;  %2059 = vmatpush3.bf16.msra.mxu1 %v2385_v9  ;;  %v2079_v36 = vpack.c.bf16 %v541_v34, %v540_v33 }
  0x1c   :  { %2066 = vmatprep.subr.bf16.mxu1 %v2277_v0  ;;  %2060 = vmatprep.subr.bf16.mxu0 %v2277_v0 }
  0x1e   :  { %1863 = vmatmul.mubr.f32.vlgmr.msra.gmra.mrb[0].mxu0 %v2279_v1 }
  0x1f   :  { %1884 = vmatprep.mubr.msk.f32.mxu0 %vm2278_vm0, %v2279_v1  ;;  %2062 = vmatpush3.bf16.msra.mxu0 %v2061_v62 }
  0x20   :  { %2063 = vmatprep.subr.bf16.mxu0 %v2277_v0 }
  0x23   :  { %2065 = vmatpush3.bf16.msra.mxu0 %v2064_v2  ;;  %v723_v2 = vld [vmem:[#allocation2 + $0x60] sm:$0xff] }
  0x24   :  { %2072 = vmatprep.subr.bf16.mxu0 %v2277_v0 }
  0x95   :  { %v72_v10 = vpop.permute.xlu0 %71 }
  0x96   :  { %v74_v12 = vmul.f32 %v2400_v11, %v72_v10 }
  0x98   :  { %v75_v14 = vadd.f32 %v2406_v13, %v74_v12 }
  0xf1   :  { %v146_v15 = vpop.f32.mrb[0].mxu0 }
  0xf2   :  { %v150_v16 = vadd.f32 %v146_v15, %v75_v14  ;;  %v1864_v17 = vpop.f32.mrb[1].mxu0 }
  0xf4   :  { %v1730_v18 = vmul.f32 -1.442695, %v150_v16 }
  0xf6   :  { %2178 = vpow2.f32 %v1730_v18 }
 0x100   :  { %v2179_v19 = vpop.eup %2178 }
 0x101   :  { %v154_v20 = vadd.f32 1.0, %v2179_v19 }
 0x103   :  { %2180 = vrcp.f32 %v154_v20 }
 0x10d   :  { %v2181_v21 = vpop.eup %2180 }
 0x10e   :  { %v157_v22 = vmul.f32 2.0, %v2181_v21  ;;  %v159_v26 = vmul.f32 0.0, %v2181_v21 }
 0x110   :  { %v1731_v23 = vadd.f32 -1.0, %v157_v22 }
 0x112   :  { %161 = vrot.lane.b32.xlu0 %v1731_v23, %s2281_s1 }
 0x184   :  { %v162_v24 = vpop.permute.xlu0 %161 }
 0x185   :  { %v164_v25 = vmul.f32 %v2181_v21, %v162_v24 }
 0x187   :  { %166 = vrot.lane.b32.xlu1 %v164_v25, %s2282_s3 }
 0x1f9   :  { %v167_v27 = vpop.permute.xlu1 %166 }
 0x1fa   :  { %v169_v28 = vadd.f32 %v167_v27, %v159_v26 }
 0x1fc   :  { %2182 = vtanh.f32 %v169_v28 }
 0x206   :  { %v2183_v29 = vpop.eup %2182 }
 0x207   :  { %172 = vrot.lane.b32.xlu1 %v2183_v29, %s2281_s1 }
 0x20b   :  { %181 = vperm.xlu1 %2171, %v2381_v8  }
 0x279   :  { %v173_v31 = vpop.permute.xlu1 %172 }
 0x27a   :  { %v175_v32 = vmul.f32 %v2181_v21, %v173_v31 }
 0x27c   :  { %187 = vrot.lane.b32.xlu0 %v175_v32, %s2282_s3 }
 0x28a   :  { %v182_v40 = vpop.permute.xlu1 %181 }
 0x28b   :  { %v184_v41 = vmul.f32 %v2400_v11, %v182_v40  ;;  %v2285_v40 = vmov 3  }
 0x28d   :  { %v185_v42 = vadd.f32 %v2406_v13, %v184_v41 }
 0x2ee   :  { %v188_v38 = vpop.permute.xlu0 %187 }
 0x2ef   :  { %1874 = vmatmul.mubr.msk.f32.vlgmr.msra.gmra.mrb[0].mxu1 %vm76_vm1, %v188_v38 }
 0x2f0   :  { %2068 = vmatpush3.bf16.msra.mxu1 %v2067_v35  ;;  %1895 = vmatprep.mubr.msk.f32.mxu1 %vm2278_vm0, %v2279_v1  ;;  %v542_v35 = vld [vmem:[#allocation2 + $0x50] sm:$0xff] }
 0x2f1   :  { %2069 = vmatprep.subr.bf16.mxu1 %v2277_v0 }
 0x2f4   :  { %2071 = vmatpush3.bf16.msra.mxu1 %v2070_v39 }
 0x2f5   :  { %2078 = vmatprep.subr.bf16.mxu1 %v2277_v0 }
 0x2f7   :  { %1896 = vmatmul.mubr.msk.f32.vlgmr.msra.gmra.mrb[2].mxu1 %vm76_vm1, %v188_v38  ;;  %v2082_v38 = vpack.c.bf16 %v543_v37, %v542_v35 }
 0x2f8   :  { %1917 = vmatprep.mubr.msk.f32.mxu1 %vm2278_vm0, %v2279_v1  ;;  %2080 = vmatpush3.bf16.msra.mxu1 %v2079_v36 }
 0x2f9   :  { %2081 = vmatprep.subr.bf16.mxu1 %v2277_v0 }
 0x2fc   :  { %2083 = vmatpush3.bf16.msra.mxu1 %v2082_v38  ;;  %v906_v38 = vld [vmem:[#allocation2 + $0x80] sm:$0xff] }
 0x2fd   :  { %2090 = vmatprep.subr.bf16.mxu1 %v2277_v0 }
 0x3c2   :  { %v257_v43 = vpop.f32.mrb[0].mxu1 }
 0x3c3   :  { %v261_v44 = vadd.f32 %v257_v43, %v185_v42  ;;  %v1875_v45 = vpop.f32.mrb[1].mxu1 }
 0x3c5   :  { %v1733_v46 = vmul.f32 -1.442695, %v261_v44 }
 0x3c7   :  { %2184 = vpow2.f32 %v1733_v46 }
 0x3ca   :  { %v433_v47 = vpop.f32.mrb[2].mxu1 }
 0x3cb   :  { %v1897_v48 = vpop.f32.mrb[3].mxu1 }
 0x3d1   :  { %v2185_v49 = vpop.eup %2184 }
 0x3d2   :  { %v265_v50 = vadd.f32 1.0, %v2185_v49 }
 0x3d4   :  { %2186 = vrcp.f32 %v265_v50 }
 0x3de   :  { %v2187_v51 = vpop.eup %2186 }
 0x3df   :  { %v268_v52 = vmul.f32 2.0, %v2187_v51  ;;  %v270_v56 = vmul.f32 %v2187_v51, %v169_v28 }
 0x3e1   :  { %v1734_v53 = vadd.f32 -1.0, %v268_v52 }
 0x3e3   :  { %272 = vrot.lane.b32.xlu0 %v1734_v53, %s2281_s1 }
 0x455   :  { %v273_v54 = vpop.permute.xlu0 %272 }
 0x456   :  { %v275_v55 = vmul.f32 %v2187_v51, %v273_v54 }
 0x458   :  { %277 = vrot.lane.b32.xlu1 %v275_v55, %s2282_s3 }
 0x4ca   :  { %v278_v57 = vpop.permute.xlu1 %277 }
 0x4cb   :  { %v280_v58 = vadd.f32 %v278_v57, %v270_v56 }
 0x4cd   :  { %2188 = vtanh.f32 %v280_v58 }
 0x4d7   :  { %v2189_v3 = vpop.eup %2188 }
 0x4d8   :  { %283 = vrot.lane.b32.xlu0 %v2189_v3, %s2281_s1  ;;  %v724_v3 = vld [vmem:[#allocation2 + $0x68] sm:$0xff] }
 0x4dc   :  { %438 = vperm.xlu0 %2172, %v2381_v8  }
 0x4e0   :  { %2173 = vset.pattern.permute.xlu0 %v2285_v40  ;;  %v908_v40 = vld [vmem:[#allocation2 + $0x90] sm:$0xff] }
 0x54a   :  { %v284_v5 = vpop.permute.xlu0 %283 }
 0x54b   :  { %v286_v7 = vmul.f32 %v2187_v51, %v284_v5  ;;  %v2091_v5 = vpack.c.bf16 %v724_v3, %v723_v2 }
 0x54d   :  { %293 = vrot.lane.b32.xlu1 %v286_v7, %s2282_s3  ;;  %v726_v7 = vld [vmem:[#allocation2 + $0x78] sm:$0xff] }
 0x55b   :  { %v439_v12 = vpop.permute.xlu0 %438 }
 0x55c   :  { %v441_v17 = vmul.f32 %v2400_v11, %v439_v12 }
 0x55e   :  { %v442_v18 = vadd.f32 %v2406_v13, %v441_v17 }
 0x5bf   :  { %v294_v10 = vpop.permute.xlu1 %293 }
 0x5c0   :  { %1885 = vmatmul.mubr.msk.f32.vlgmr.msra.gmra.mrb[2].mxu0 %vm76_vm1, %v294_v10 }
 0x5c1   :  { %2074 = vmatpush3.bf16.msra.mxu0 %v2373_v6  ;;  %1906 = vmatprep.mubr.msk.f32.mxu0 %vm2278_vm0, %v2279_v1 }
 0x5c2   :  { %2075 = vmatprep.subr.bf16.mxu0 %v2277_v0 }
 0x5c5   :  { %2077 = vmatpush3.bf16.msra.mxu0 %v2385_v9 }
 0x5c6   :  { %2084 = vmatprep.subr.bf16.mxu0 %v2277_v0 }
 0x5c8   :  { %1907 = vmatmul.mubr.msk.f32.vlgmr.msra.gmra.mrb[4].mxu0 %vm76_vm1, %v294_v10  ;;  %v2094_v10 = vpack.c.bf16 %v726_v7, %v725_v4 }
 0x5c9   :  { %2086 = vmatpush3.bf16.msra.mxu0 %v2373_v6  ;;  %1928 = vmatprep.mubr.msk.f32.mxu0 %vm2278_vm0, %v2279_v1 }
 0x5ca   :  { %2087 = vmatprep.subr.bf16.mxu0 %v2277_v0 }
 0x5cd   :  { %2089 = vmatpush3.bf16.msra.mxu0 %v2385_v9 }
 0x5ce   :  { %2096 = vmatprep.subr.bf16.mxu0 %v2277_v0 }
 0x693   :  { %v363_v14 = vpop.f32.mrb[2].mxu0 }
 0x694   :  { %v434_v15 = vadd.f32 %v433_v47, %v363_v14  ;;  %v1886_v16 = vpop.f32.mrb[3].mxu0  ;;  %v2286_v14 = vmov 4  }
 0x69b   :  { %v509_v19 = vpop.f32.mrb[4].mxu0 }
 0x69c   :  { %v513_v20 = vadd.f32 %v509_v19, %v442_v18  ;;  %v1908_v21 = vpop.f32.mrb[5].mxu0 }
 0x69e   :  { %v1738_v22 = vmul.f32 -1.442695, %v513_v20 }
 0x6a0   :  { %2190 = vpow2.f32 %v1738_v22 }
 0x6aa   :  { %v2191_v23 = vpop.eup %2190 }
 0x6ab   :  { %v517_v24 = vadd.f32 1.0, %v2191_v23 }
 0x6ad   :  { %2192 = vrcp.f32 %v517_v24 }
 0x6b7   :  { %v2193_v25 = vpop.eup %2192 }
 0x6b8   :  { %v520_v26 = vmul.f32 2.0, %v2193_v25  ;;  %v522_v30 = vmul.f32 %v2193_v25, %v280_v58 }
 0x6ba   :  { %v1739_v27 = vadd.f32 -1.0, %v520_v26 }
 0x6bc   :  { %524 = vrot.lane.b32.xlu1 %v1739_v27, %s2281_s1 }
 0x72e   :  { %v525_v28 = vpop.permute.xlu1 %524 }
 0x72f   :  { %v527_v29 = vmul.f32 %v2193_v25, %v525_v28 }
 0x731   :  { %529 = vrot.lane.b32.xlu1 %v527_v29, %s2282_s3 }
 0x7a3   :  { %v530_v31 = vpop.permute.xlu1 %529 }
 0x7a4   :  { %v532_v32 = vadd.f32 %v530_v31, %v522_v30 }
 0x7a6   :  { %2194 = vtanh.f32 %v532_v32 }
 0x7b0   :  { %v2195_v39 = vpop.eup %2194 }
 0x7b1   :  { %535 = vrot.lane.b32.xlu0 %v2195_v39, %s2281_s1  ;;  %v907_v39 = vld [vmem:[#allocation2 + $0x88] sm:$0xff] }
 0x7b5   :  { %621 = vperm.xlu0 %2173, %v2381_v8  }
 0x7b9   :  { %2174 = vset.pattern.permute.xlu0 %v2286_v14  ;;  %v1091_v14 = vld [vmem:[#allocation2 + $0xb0] sm:$0xff] }
 0x823   :  { %v536_v41 = vpop.permute.xlu0 %535 }
 0x824   :  { %v538_v42 = vmul.f32 %v2193_v25, %v536_v41  ;;  %v2103_v41 = vpack.c.bf16 %v907_v39, %v906_v38 }
 0x826   :  { %545 = vrot.lane.b32.xlu1 %v538_v42, %s2282_s3  ;;  %v909_v42 = vld [vmem:[#allocation2 + $0x98] sm:$0xff] }
 0x834   :  { %v622_v44 = vpop.permute.xlu0 %621 }
 0x835   :  { %v624_v45 = vmul.f32 %v2400_v11, %v622_v44 }
 0x837   :  { %v625_v46 = vadd.f32 %v2406_v13, %v624_v45  ;;  %v2287_v45 = vmov 5  }
 0x898   :  { %v546_v43 = vpop.permute.xlu1 %545 }
 0x899   :  { %1918 = vmatmul.mubr.msk.f32.vlgmr.msra.gmra.mrb[4].mxu1 %vm76_vm1, %v546_v43  ;;  %1929 = vmatmul.mubr.msk.f32.vlgmr.msra.gmra.mrb[6].mxu0 %vm76_vm1, %v546_v43  ;;  %v2106_v43 = vpack.c.bf16 %v909_v42, %v908_v40  ;;  %v1273_v42 = vld [vmem:[#allocation2 + $0xc8] sm:$0xff] }
 0x89a   :  { %2098 = vmatpush3.bf16.msra.mxu0 %v2373_v6  ;;  %1939 = vmatprep.mubr.msk.f32.mxu1 %vm2278_vm0, %v2279_v1 }
 0x89b   :  { %2099 = vmatprep.subr.bf16.mxu0 %v2277_v0  ;;  %1950 = vmatprep.mubr.msk.f32.mxu0 %vm2278_vm0, %v2279_v1 }
 0x89c   :  { %2092 = vmatpush3.bf16.msra.mxu1 %v2091_v5 }
 0x89d   :  { %2093 = vmatprep.subr.bf16.mxu1 %v2277_v0 }
 0x89e   :  { %2101 = vmatpush3.bf16.msra.mxu0 %v2385_v9 }
 0x89f   :  { %2108 = vmatprep.subr.bf16.mxu0 %v2277_v0 }
 0x8a0   :  { %2095 = vmatpush3.bf16.msra.mxu1 %v2094_v10  ;;  %v1089_v10 = vld [vmem:[#allocation2 + $0xa0] sm:$0xff] }
 0x8a1   :  { %2102 = vmatprep.subr.bf16.mxu1 %v2277_v0 }
 0x96c   :  { %v615_v47 = vpop.f32.mrb[4].mxu1  ;;  %v692_v48 = vpop.f32.mrb[6].mxu0 }
 0x96d   :  { %v619_v49 = vadd.f32 %v615_v47, %v434_v15  ;;  %v696_v50 = vadd.f32 %v692_v48, %v625_v46  ;;  %v1919_v51 = vpop.f32.mrb[5].mxu1  ;;  %v1930_v52 = vpop.f32.mrb[7].mxu0 }
 0x96f   :  { %v1742_v53 = vmul.f32 -1.442695, %v696_v50 }
 0x971   :  { %2196 = vpow2.f32 %v1742_v53 }
 0x97b   :  { %v2197_v54 = vpop.eup %2196 }
 0x97c   :  { %v700_v55 = vadd.f32 1.0, %v2197_v54 }
 0x97e   :  { %2198 = vrcp.f32 %v700_v55 }
 0x988   :  { %v2199_v56 = vpop.eup %2198 }
 0x989   :  { %v703_v57 = vmul.f32 2.0, %v2199_v56  ;;  %v705_v61 = vmul.f32 %v2199_v56, %v532_v32 }
 0x98b   :  { %v1743_v58 = vadd.f32 -1.0, %v703_v57 }
 0x98d   :  { %707 = vrot.lane.b32.xlu1 %v1743_v58, %s2281_s1 }
 0x9ff   :  { %v708_v59 = vpop.permute.xlu1 %707 }
 0xa00   :  { %v710_v60 = vmul.f32 %v2199_v56, %v708_v59 }
 0xa02   :  { %712 = vrot.lane.b32.xlu1 %v710_v60, %s2282_s3 }
 0xa74   :  { %v713_v62 = vpop.permute.xlu1 %712 }
 0xa75   :  { %v715_v63 = vadd.f32 %v713_v62, %v705_v61 }
 0xa77   :  { %2200 = vtanh.f32 %v715_v63 }
 0xa81   :  { %v2201_v12 = vpop.eup %2200 }
 0xa82   :  { %718 = vrot.lane.b32.xlu0 %v2201_v12, %s2281_s1  ;;  %v1090_v12 = vld [vmem:[#allocation2 + $0xa8] sm:$0xff] }
 0xa86   :  { %804 = vperm.xlu0 %2174, %v2381_v8  }
 0xa8a   :  { %2175 = vset.pattern.permute.xlu0 %v2287_v45  ;;  %v1275_v45 = vld [vmem:[#allocation2 + $0xd8] sm:$0xff] }
 0xaf4   :  { %v719_v15 = vpop.permute.xlu0 %718 }
 0xaf5   :  { %v721_v16 = vmul.f32 %v2199_v56, %v719_v15  ;;  %v2115_v15 = vpack.c.bf16 %v1090_v12, %v1089_v10  ;;  %v1455_v10 = vld [vmem:[#allocation2 + $0xe0] sm:$0xff]  ;;  %v1456_v12 = vld [vmem:[#allocation2 + $0xe8] sm:$0xff] }
 0xaf7   :  { %728 = vrot.lane.b32.xlu1 %v721_v16, %s2282_s3  ;;  %v1092_v16 = vld [vmem:[#allocation2 + $0xb8] sm:$0xff] }
 0xb05   :  { %v805_v18 = vpop.permute.xlu0 %804 }
 0xb06   :  { %v807_v19 = vmul.f32 %v2400_v11, %v805_v18 }
 0xb08   :  { %v808_v20 = vadd.f32 %v2406_v13, %v807_v19  ;;  %v2288_v19 = vmov 6  }
 0xb69   :  { %v729_v17 = vpop.permute.xlu1 %728 }
 0xb6a   :  { %1940 = vmatmul.mubr.msk.f32.vlgmr.msra.gmra.mrb[6].mxu1 %vm76_vm1, %v729_v17  ;;  %1951 = vmatmul.mubr.msk.f32.vlgmr.msra.gmra.mrb[8].mxu0 %vm76_vm1, %v729_v17  ;;  %v2118_v17 = vpack.c.bf16 %v1092_v16, %v1091_v14  ;;  %v1457_v14 = vld [vmem:[#allocation2 + $0xf0] sm:$0xff]  ;;  %v1458_v16 = vld [vmem:[#allocation2 + $0xf8] sm:$0xff] }
 0xb6b   :  { %2110 = vmatpush3.bf16.msra.mxu0 %v2373_v6  ;;  %1961 = vmatprep.mubr.msk.f32.mxu1 %vm2278_vm0, %v2279_v1 }
 0xb6c   :  { %2111 = vmatprep.subr.bf16.mxu0 %v2277_v0  ;;  %1972 = vmatprep.mubr.msk.f32.mxu0 %vm2278_vm0, %v2279_v1 }
 0xb6d   :  { %2104 = vmatpush3.bf16.msra.mxu1 %v2103_v41  ;;  %v1272_v41 = vld [vmem:[#allocation2 + $0xc0] sm:$0xff] }
 0xb6e   :  { %2105 = vmatprep.subr.bf16.mxu1 %v2277_v0 }
 0xb6f   :  { %2113 = vmatpush3.bf16.msra.mxu0 %v2385_v9 }
 0xb70   :  { %2120 = vmatprep.subr.bf16.mxu0 %v2277_v0 }
 0xb71   :  { %2107 = vmatpush3.bf16.msra.mxu1 %v2106_v43  ;;  %v1274_v43 = vld [vmem:[#allocation2 + $0xd0] sm:$0xff] }
 0xb72   :  { %2114 = vmatprep.subr.bf16.mxu1 %v2277_v0 }
 0xc3d   :  { %v798_v21 = vpop.f32.mrb[6].mxu1  ;;  %v875_v22 = vpop.f32.mrb[8].mxu0 }
 0xc3e   :  { %v802_v23 = vadd.f32 %v798_v21, %v619_v49  ;;  %v879_v24 = vadd.f32 %v875_v22, %v808_v20  ;;  %v1941_v25 = vpop.f32.mrb[7].mxu1  ;;  %v1952_v26 = vpop.f32.mrb[9].mxu0 }
 0xc40   :  { %v1746_v27 = vmul.f32 -1.442695, %v879_v24 }
 0xc42   :  { %2202 = vpow2.f32 %v1746_v27 }
 0xc4c   :  { %v2203_v28 = vpop.eup %2202 }
 0xc4d   :  { %v883_v29 = vadd.f32 1.0, %v2203_v28 }
 0xc4f   :  { %2204 = vrcp.f32 %v883_v29 }
 0xc59   :  { %v2205_v30 = vpop.eup %2204 }
 0xc5a   :  { %v886_v31 = vmul.f32 2.0, %v2205_v30  ;;  %v888_v35 = vmul.f32 %v2205_v30, %v715_v63 }
 0xc5c   :  { %v1747_v32 = vadd.f32 -1.0, %v886_v31 }
 0xc5e   :  { %890 = vrot.lane.b32.xlu1 %v1747_v32, %s2281_s1 }
 0xcd0   :  { %v891_v33 = vpop.permute.xlu1 %890 }
 0xcd1   :  { %v893_v34 = vmul.f32 %v2205_v30, %v891_v33 }
 0xcd3   :  { %895 = vrot.lane.b32.xlu1 %v893_v34, %s2282_s3 }
 0xd45   :  { %v896_v36 = vpop.permute.xlu1 %895 }
 0xd46   :  { %v898_v37 = vadd.f32 %v896_v36, %v888_v35 }
 0xd48   :  { %2206 = vtanh.f32 %v898_v37 }
 0xd52   :  { %v2207_v44 = vpop.eup %2206 }
 0xd53   :  { %901 = vrot.lane.b32.xlu0 %v2207_v44, %s2281_s1  ;;  %v2127_v44 = vpack.c.bf16 %v1273_v42, %v1272_v41 }
 0xd57   :  { %987 = vperm.xlu0 %2175, %v2381_v8  }
 0xd5b   :  { %2176 = vset.pattern.permute.xlu0 %v2288_v19 }
 0xdc5   :  { %v902_v46 = vpop.permute.xlu0 %901 }
 0xdc6   :  { %v904_v47 = vmul.f32 %v2205_v30, %v902_v46  ;;  %v2130_v46 = vpack.c.bf16 %v1275_v45, %v1274_v43 }
 0xdc8   :  { %911 = vrot.lane.b32.xlu1 %v904_v47, %s2282_s3 }
 0xdd6   :  { %v988_v49 = vpop.permute.xlu0 %987 }
 0xdd7   :  { %v990_v50 = vmul.f32 %v2400_v11, %v988_v49 }
 0xdd9   :  { %v991_v51 = vadd.f32 %v2406_v13, %v990_v50 }
 0xe3a   :  { %v912_v48 = vpop.permute.xlu1 %911 }
 0xe3b   :  { %1962 = vmatmul.mubr.msk.f32.vlgmr.msra.gmra.mrb[8].mxu1 %vm76_vm1, %v912_v48  ;;  %1973 = vmatmul.mubr.msk.f32.vlgmr.msra.gmra.mrb[10].mxu0 %vm76_vm1, %v912_v48  ;;  %v2289_v48 = vmov 7  }
 0xe3c   :  { %2122 = vmatpush3.bf16.msra.mxu0 %v2373_v6  ;;  %1983 = vmatprep.mubr.msk.f32.mxu1 %vm2278_vm0, %v2279_v1 }
 0xe3d   :  { %2123 = vmatprep.subr.bf16.mxu0 %v2277_v0  ;;  %1994 = vmatprep.mubr.msk.f32.mxu0 %vm2278_vm0, %v2279_v1 }
 0xe3e   :  { %2116 = vmatpush3.bf16.msra.mxu1 %v2115_v15  ;;  %v2139_v15 = vpack.c.bf16 %v1456_v12, %v1455_v10 }
 0xe3f   :  { %2117 = vmatprep.subr.bf16.mxu1 %v2277_v0 }
 0xe40   :  { %2125 = vmatpush3.bf16.msra.mxu0 %v2385_v9 }
 0xe41   :  { %2132 = vmatprep.subr.bf16.mxu0 %v2277_v0 }
 0xe42   :  { %2119 = vmatpush3.bf16.msra.mxu1 %v2118_v17  ;;  %v2142_v17 = vpack.c.bf16 %v1458_v16, %v1457_v14 }
 0xe43   :  { %2126 = vmatprep.subr.bf16.mxu1 %v2277_v0 }
 0xf0e   :  { %v981_v52 = vpop.f32.mrb[8].mxu1  ;;  %v1058_v53 = vpop.f32.mrb[10].mxu0 }
 0xf0f   :  { %v985_v54 = vadd.f32 %v981_v52, %v802_v23  ;;  %v1062_v55 = vadd.f32 %v1058_v53, %v991_v51  ;;  %v1963_v56 = vpop.f32.mrb[9].mxu1  ;;  %v1974_v57 = vpop.f32.mrb[11].mxu0 }
 0xf11   :  { %v1750_v58 = vmul.f32 -1.442695, %v1062_v55 }
 0xf13   :  { %2208 = vpow2.f32 %v1750_v58 }
 0xf1d   :  { %v2209_v59 = vpop.eup %2208 }
 0xf1e   :  { %v1066_v60 = vadd.f32 1.0, %v2209_v59 }
 0xf20   :  { %2210 = vrcp.f32 %v1066_v60 }
 0xf2a   :  { %v2211_v61 = vpop.eup %2210 }
 0xf2b   :  { %v1069_v62 = vmul.f32 2.0, %v2211_v61  ;;  %v1071_v4 = vmul.f32 %v2211_v61, %v898_v37 }
 0xf2d   :  { %v1751_v63 = vadd.f32 -1.0, %v1069_v62 }
 0xf2f   :  { %1073 = vrot.lane.b32.xlu1 %v1751_v63, %s2281_s1 }
 0xfa1   :  { %v1074_v2 = vpop.permute.xlu1 %1073 }
 0xfa2   :  { %v1076_v3 = vmul.f32 %v2211_v61, %v1074_v2 }
 0xfa4   :  { %1078 = vrot.lane.b32.xlu1 %v1076_v3, %s2282_s3 }
0x1016   :  { %v1079_v5 = vpop.permute.xlu1 %1078 }
0x1017   :  { %v1081_v7 = vadd.f32 %v1079_v5, %v1071_v4 }
0x1019   :  { %2212 = vtanh.f32 %v1081_v7 }
0x1023   :  { %v2213_v18 = vpop.eup %2212 }
0x1024   :  { %1084 = vrot.lane.b32.xlu0 %v2213_v18, %s2281_s1 }
0x1028   :  { %1170 = vperm.xlu0 %2176, %v2381_v8  }
0x102c   :  { %2177 = vset.pattern.permute.xlu0 %v2289_v48 }
0x1096   :  { %v1085_v20 = vpop.permute.xlu0 %1084 }
0x1097   :  { %v1087_v21 = vmul.f32 %v2211_v61, %v1085_v20 }
0x1099   :  { %1094 = vrot.lane.b32.xlu1 %v1087_v21, %s2282_s3 }
0x10a7   :  { %v1171_v23 = vpop.permute.xlu0 %1170 }
0x10a8   :  { %v1173_v24 = vmul.f32 %v2400_v11, %v1171_v23  ;;  %v1537_v23 = vld [vmem:[%s2594_s6 + $0x8] sm:$0xff] }
0x10aa   :  { %v1174_v25 = vadd.f32 %v2406_v13, %v1173_v24 }
0x110b   :  { %v1095_v22 = vpop.permute.xlu1 %1094 }
0x110c   :  { %1984 = vmatmul.mubr.msk.f32.vlgmr.msra.gmra.mrb[10].mxu1 %vm76_vm1, %v1095_v22  ;;  %1995 = vmatmul.mubr.msk.f32.vlgmr.msra.gmra.mrb[12].mxu0 %vm76_vm1, %v1095_v22  ;;  %v1536_v22 = vld [vmem:[%s2594_s6] sm:$0xff] }
0x110d   :  { %2134 = vmatpush3.bf16.msra.mxu0 %v2373_v6  ;;  %2005 = vmatprep.mubr.msk.f32.mxu1 %vm2278_vm0, %v2279_v1  ;;  %v2145_v24 = vpack.c.bf16 %v1537_v23, %v1536_v22 }
0x110e   :  { %2135 = vmatprep.subr.bf16.mxu0 %v2277_v0  ;;  %2016 = vmatprep.mubr.msk.f32.mxu0 %vm2278_vm0, %v2279_v1 }
0x110f   :  { %2128 = vmatpush3.bf16.msra.mxu1 %v2127_v44 }
0x1110   :  { %2129 = vmatprep.subr.bf16.mxu1 %v2277_v0 }
0x1111   :  { %2137 = vmatpush3.bf16.msra.mxu0 %v2385_v9 }
0x1112   :  { %2144 = vmatprep.subr.bf16.mxu0 %v2277_v0 }
0x1113   :  { %2131 = vmatpush3.bf16.msra.mxu1 %v2130_v46 }
0x1114   :  { %2138 = vmatprep.subr.bf16.mxu1 %v2277_v0 }
0x11df   :  { %v1164_v26 = vpop.f32.mrb[10].mxu1  ;;  %v1241_v27 = vpop.f32.mrb[12].mxu0 }
0x11e0   :  { %v1168_v6 = vadd.f32 %v1164_v26, %v985_v54  ;;  %v1245_v28 = vadd.f32 %v1241_v27, %v1174_v25  ;;  %v1985_v29 = vpop.f32.mrb[11].mxu1  ;;  %v1996_v30 = vpop.f32.mrb[13].mxu0  ;;  %v1538_v25 = vld [vmem:[%s2594_s6 + $0x10] sm:$0xff]  ;;  %v1541_v27 = vld [vmem:[%s2596_s8] sm:$0xff] }
0x11e1   :  { %v1761_v29 = vld [vmem:[%s2593_s5] ss:$0 sm:$0xff]  ;;  %s2290_s5 = smov [#allocation5]  }
0x11e2   :  { %v1754_v31 = vmul.f32 -1.442695, %v1245_v28  ;;  %s1719_s13 = sshll.u32 %s2290_s5, 4  ;;  %s1720_s13 = int_to_ptr.vmem [resolvable:$true] %s1719_s13 }
0x11e3   :  { %s2248_s14 = scalar_lea.vmem %s1720_s13, 32  ;;  %p2253_p9 = scmp.lt.s32.totalorder %s1720_s13, %s1720_s13 }
0x11e4   :  { %2214 = vpow2.f32 %v1754_v31  ;;  %p2249_p8 = scmp.ne.s32.totalorder %s1720_s13, %s2248_s14  ;;  %p2254_p10 = scmp.lt.s32.totalorder %s2248_s14, %s2248_s14 }
0x11e6   :  { %p2255_p11 = por %p2254_p10, %p2253_p9 }
0x11e8   :  { %p2256_p12 = pnand %p2255_p11, %p2249_p8 }
0x11ee   :  { %v2215_v32 = vpop.eup %2214 }
0x11ef   :  { %v1249_v33 = vadd.f32 1.0, %v2215_v32 }
0x11f1   :  { %2216 = vrcp.f32 %v1249_v33 }
0x11fb   :  { %v2217_v34 = vpop.eup %2216 }
0x11fc   :  { %v1252_v9 = vmul.f32 2.0, %v2217_v34  ;;  %v1254_v38 = vmul.f32 %v2217_v34, %v1081_v7 }
0x11fe   :  { %v1755_v35 = vadd.f32 -1.0, %v1252_v9 }
0x1200   :  { %1256 = vrot.lane.b32.xlu1 %v1755_v35, %s2281_s1 }
0x1272   :  { %v1257_v36 = vpop.permute.xlu1 %1256 }
0x1273   :  { %v1259_v37 = vmul.f32 %v2217_v34, %v1257_v36 }
0x1275   :  { %1261 = vrot.lane.b32.xlu1 %v1259_v37, %s2282_s3  ;;  %v1764_v37 = vld [vmem:[%s2597_s9] ss:$0 sm:$0xff] }
0x12e7   :  { %v1262_v39 = vpop.permute.xlu1 %1261 }
0x12e8   :  { %v1264_v40 = vadd.f32 %v1262_v39, %v1254_v38 }
0x12ea   :  { %2218 = vtanh.f32 %v1264_v40 }
0x12f4   :  { %v2219_v47 = vpop.eup %2218 }
0x12f5   :  { %1267 = vrot.lane.b32.xlu0 %v2219_v47, %s2281_s1 }
0x12f9   :  { %1353 = vperm.xlu0 %2177, %v2381_v8  }
0x1367   :  { %v1268_v49 = vpop.permute.xlu0 %1267 }
0x1368   :  { %v1270_v50 = vmul.f32 %v2217_v34, %v1268_v49  ;;  %v1762_v34 = vld [vmem:[%s2595_s7] ss:$0 sm:$0xff] }
0x136a   :  { %1277 = vrot.lane.b32.xlu1 %v1270_v50, %s2282_s3 }
0x1378   :  { %v1354_v52 = vpop.permute.xlu0 %1353 }
0x1379   :  { %v1356_v53 = vmul.f32 %v2400_v11, %v1354_v52 }
0x137b   :  { %v1357_v8 = vadd.f32 %v2406_v13, %v1356_v53 }
0x13dc   :  { %v1278_v51 = vpop.permute.xlu1 %1277 }
0x13dd   :  { %2006 = vmatmul.mubr.msk.f32.vlgmr.msra.gmra.mrb[12].mxu1 %vm76_vm1, %v1278_v51  ;;  %2017 = vmatmul.mubr.msk.f32.vlgmr.msra.gmra.mrb[14].mxu0 %vm76_vm1, %v1278_v51 }
0x13de   :  { %2027 = vmatprep.mubr.msk.f32.mxu1 %vm2278_vm0, %v2279_v1  ;;  %2038 = vmatprep.mubr.msk.f32.mxu0 %vm2278_vm0, %v2279_v1 }
0x13df   :  { %2140 = vmatpush3.bf16.msra.mxu1 %v2139_v15  ;;  %2146 = vmatpush3.bf16.msra.mxu0 %v2145_v24 }
0x13e0   :  { %2141 = vmatprep.subr.bf16.mxu1 %v2277_v0  ;;  %2147 = vmatprep.subr.bf16.mxu0 %v2277_v0 }
0x13e3   :  { %2143 = vmatpush3.bf16.msra.mxu1 %v2142_v17 }
0x13e4   :  { %2150 = vmatprep.subr.bf16.mxu1 %v2277_v0 }
0x14b0   :  { %v1347_v54 = vpop.f32.mrb[12].mxu1  ;;  %v1424_v55 = vpop.f32.mrb[14].mxu0 }
0x14b1   :  { %v1351_v56 = vadd.f32 %v1347_v54, %v1168_v6  ;;  %v1428_v57 = vadd.f32 %v1424_v55, %v1357_v8  ;;  %v2007_v58 = vpop.f32.mrb[13].mxu1  ;;  %v2018_v59 = vpop.f32.mrb[15].mxu0  ;;  %v1542_v6 = vld [vmem:[%s2596_s8 + $0x8] sm:$0xff] }
0x14b2   :  { %v2151_v28 = vpack.c.bf16 %v1542_v6, %v1541_v27 }
0x14b3   :  { %v1758_v60 = vmul.f32 -1.442695, %v1428_v57 }
0x14b5   :  { %2220 = vpow2.f32 %v1758_v60 }
0x14bf   :  { %v2221_v61 = vpop.eup %2220 }
0x14c0   :  { %v1432_v62 = vadd.f32 1.0, %v2221_v61 }
0x14c2   :  { %2222 = vrcp.f32 %v1432_v62 }
0x14cc   :  { %v2223_v63 = vpop.eup %2222 }
0x14cd   :  { %v1435_v2 = vmul.f32 2.0, %v2223_v63  ;;  %v1437_v13 = vmul.f32 %v2223_v63, %v1264_v40 }
0x14cf   :  { %v1759_v3 = vadd.f32 -1.0, %v1435_v2 }
0x14d1   :  { %1439 = vrot.lane.b32.xlu1 %v1759_v3, %s2281_s1 }
0x1543   :  { %v1440_v4 = vpop.permute.xlu1 %1439 }
0x1544   :  { %v1442_v11 = vmul.f32 %v2223_v63, %v1440_v4 }
0x1546   :  { %1444 = vrot.lane.b32.xlu1 %v1442_v11, %s2282_s3 }
0x15b8   :  { %v1445_v5 = vpop.permute.xlu1 %1444 }
0x15b9   :  { %v1447_v7 = vadd.f32 %v1445_v5, %v1437_v13 }
0x15bb   :  { %2224 = vtanh.f32 %v1447_v7 }
0x15c5   :  { %v2225_v18 = vpop.eup %2224 }
0x15c6   :  { %1450 = vrot.lane.b32.xlu0 %v2225_v18, %s2281_s1 }
0x1638   :  { %v1451_v19 = vpop.permute.xlu0 %1450 }
0x1639   :  { %v1453_v20 = vmul.f32 %v2223_v63, %v1451_v19 }
0x163b   :  { %1460 = vrot.lane.b32.xlu1 %v1453_v20, %s2282_s3 }
0x16ad   :  { %v1461_v21 = vpop.permute.xlu1 %1460 }
0x16ae   :  { %2028 = vmatmul.mubr.msk.f32.vlgmr.msra.gmra.mrb[14].mxu1 %vm76_vm1, %v1461_v21 }
0x16af   :  { %2045 = vmatprep.mubr.msk.f32.mxu1 %vm2278_vm0, %v2279_v1  ;;  %v1539_v1 = vld [vmem:[%s2594_s6 + $0x18] sm:$0xff]  ;;  %2152 = vmatpush3.bf16.msra.mxu1 %v2151_v28 }
0x16b0   :  { %v2148_v26 = vpack.c.bf16 %v1539_v1, %v1538_v25 }
0x16b2   :  { %2149 = vmatpush3.bf16.msra.mxu0 %v2148_v26 }
0x1781   :  { %v1530_v0 = vpop.f32.mrb[14].mxu1 }
0x1782   :  { %v1534_v30 = vadd.f32 %v1530_v0, %v1351_v56  ;;  %v2029_v31 = vpop.f32.mrb[15].mxu1 }
0x1784   :  { %v1550_v32 = vadd.f32 %v1761_v29, %v1534_v30 }
0x1786   :  { %v1551_v33 = vmax.f32 %v1550_v32, 0.0 }
0x1788   :  { %2039 = vmatmul.mubr.msk.f32.vlgmr.msra.gmra.mrb[16].mxu0 %vm76_vm1, %v1551_v33 }
0x185b   :  { %v1627_v9 = vpop.f32.mrb[16].mxu0 }
0x185c   :  { %v1628_v35 = vadd.f32 %v1762_v34, %v1627_v9  ;;  %v2040_v36 = vpop.f32.mrb[17].mxu0 }
0x185e   :  { %2046 = vmatmul.mubr.msk.f32.vlgmr.msra.gmra.mrb[16].mxu1 %vm1637_vm2, %v1628_v35 }
0x1931   :  { %v1707_v38 = vpop.f32.mrb[16].mxu1 }
0x1932   :  { %v1708_v39 = vadd.f32 %v1764_v37, %v1707_v38  ;;  %v2047_v40 = vpop.f32.mrb[17].mxu1 }
0x1934   :  { %1712 = vst.msk [vmem:[#allocation5] sm:$0x3] %vm1711_vm3, %v1708_v39 }
0x1935   :  { %2259 = shalt.err (!%p2256_p12)
}
0x1936   :  { %s2260_s0 = scalar_lea.hbm %s2598_s10, 32 }
0x1937   :  { %p2261_p13 = scmp.ne.s32.totalorder %s2598_s10, %s2260_s0  ;;  %p2264_p0 = scmp.lt.u32.totalorder %s2260_s0, %s2598_s10 }
0x1939   :  { %p2266_p1 = pnand %p2264_p0, %p2261_p13 }
0x193b   :  { %2269 = shalt.err (!%p2266_p1)
}
0x193c   :  { %1722 = dma.vmem_to_hbm [thread:$0]  %s1720_s13, 32, %s2598_s10, [#allocation4]  }
0x193d   :  { %2272 = dma.done.wait [#allocation4], 32  }
0x193e   :  { %2273 = vsyncadd [#allocation4], 4294967264 }
0x193f   :  { %1726 = vsyncpa [#allocation3], 1 }
0x1940   :  { %1727 = vsyncpa [#allocation4], 1 }

</bundles_post_ra>
